<compile_context>
chip_gen: v5e
topology: v5e:2x2
jax: 0.10.0
libtpu: 0.0.40
codegen_flags: <defaults>
</compile_context>

<pallas_src>
import math

import jax
import jax.numpy as jnp
from jax.experimental import pallas as pl
from jax.experimental.pallas import tpu as pltpu


def _dct_and_mask(size: int, groups: int):
    """DCT basis A (size, size) and the radial frequency-band mask (groups, size, size)."""
    i = jnp.arange(size, dtype=jnp.float32)[:, None]
    j = jnp.arange(size, dtype=jnp.float32)[None, :]
    a = jnp.where(i == 0, math.sqrt(1.0 / size), math.sqrt(2.0 / size))
    A = a * jnp.cos(math.pi * i / size * (j + 0.5))
    # TODO(synk): the original torch get_dct_filter only fills A[size-1] through a buggy
    # list comprehension; we implement the evident intent:
    # mask[g, i, j] = (floor(sqrt(i^2 + j^2)) // (size // groups) == g).
    mul = size // groups
    band = jnp.floor(jnp.sqrt(i * i + j * j) / float(mul))
    mask = band[None, :, :] == jnp.arange(groups, dtype=jnp.float32)[:, None, None]
    return A.astype(jnp.float32), mask.astype(jnp.float32)


def _sge_kernel(x_ref, m_ref, wb_ref, o_ref):
    # x_ref/o_ref: (TN, cpg, HW) in x.dtype; m_ref: (cpg, HW) f32, grid-invariant;
    # wb_ref: (TN, 2) f32 with [:, 0] = weight[g], [:, 1] = bias[g].
    x = x_ref[...]                       # original dtype; no full-tile f32 copy is kept
    m = m_ref[...]
    cpg = x.shape[1]
    hw = x.shape[2]

    # Frequency-weighted channel sum, accumulated channel-by-channel so only
    # (TN, HW)-sized f32 intermediates stay live (no (TN, cpg, HW) f32 temp).
    xn = x[:, 0, :].astype(jnp.float32) * m[0:1, :]
    for ch in range(1, cpg):
        xn = xn + x[:, ch, :].astype(jnp.float32) * m[ch:ch + 1, :]

    # One-pass statistics folded into a single per-row affine.
    s = jnp.sum(xn, axis=-1, keepdims=True)            # (TN, 1)
    ss = jnp.sum(xn * xn, axis=-1, keepdims=True)      # (TN, 1)
    mean = s * jnp.float32(1.0 / hw)
    var = (ss - s * mean) * jnp.float32(1.0 / max(hw - 1, 1))   # torch std: unbiased (N-1)
    var = jnp.maximum(var, 0.0)                         # guard f32 cancellation
    inv = 1.0 / (jnp.sqrt(var) + 1e-5)                  # tiny (TN,1): exact divide is free

    wb = wb_ref[...]                                    # (TN, 2)
    scale = wb[:, 0:1] * inv                            # (TN, 1)
    shift = wb[:, 1:2] - mean * scale                   # (TN, 1)
    gate = jax.nn.sigmoid(xn * scale + shift).astype(o_ref.dtype)   # (TN, HW)

    # Final multiply in the input dtype (feedback: don't keep an f32 x tile live).
    o_ref[...] = x * gate[:, None, :]


def _vmem_capacity_bytes():
    try:
        return int(pltpu.get_tpu_info().vmem_capacity_bytes)
    except Exception:
        return 64 * 1024 * 1024            # conservative fallback (v7x per-TC)


def _pick_block_rows(n_rows, cpg, hw, itemsize, tile_budget_bytes):
    """Rows per grid step such that the pipelined working set fits the VMEM budget."""
    cpg_p = -(-cpg // 8) * 8               # sublane padding
    hw_p = -(-hw // 128) * 128             # lane padding
    per_row = (
        2 * 2 * cpg_p * hw_p * itemsize    # x-in + out tiles, double-buffered
        + cpg_p * hw_p * 4                 # allowance for compiler-materialized f32 temps
        + 8 * hw_p * 4                     # (TN, HW) f32 row temps (xn, t, gate, ...)
    )
    fixed = 2 * cpg_p * hw_p * 4 + 4 * 8 * 128 * 4     # M (double-buffered) + wb tiles
    avail = max(tile_budget_bytes - fixed, per_row)
    return max(1, avail // per_row)


def spatial_freq_group_enhance(x, weight, bias, A, mask, groups, *, block_rows=None):
    b, c, h, w = x.shape
    cpg = c // groups
    assert c % groups == 0 and cpg == groups, "torch mask broadcast requires c == groups**2"
    assert h == w == A.shape[0] and mask.shape == (groups, h, w)
    n = b * groups
    hw = h * w
    itemsize = jnp.dtype(x.dtype).itemsize

    # Host-side glue: lane-dense layout + fused per-channel multiplier + merged affine params.
    x_r = x.reshape(n, cpg, hw)
    M = ((A * A.T)[None, :, :] * mask).reshape(cpg, hw).astype(jnp.float32)
    w_flat = jnp.tile(weight.reshape(-1).astype(jnp.float32), b)   # weight[n % groups]
    b_flat = jnp.tile(bias.reshape(-1).astype(jnp.float32), b)
    wb = jnp.stack([w_flat, b_flat], axis=-1)                      # (n, 2)

    # VMEM-aware tile sizing (64 MiB/TC on v7x, 128 MiB on v5e/v6e).
    vmem_cap = _vmem_capacity_bytes()
    tile_budget = int(vmem_cap * 0.5)
    vmem_limit = int(vmem_cap * 0.75)

    if block_rows is not None:
        tn = min(int(block_rows), n)
    else:
        tn_vmem = _pick_block_rows(n, cpg, hw, itemsize, tile_budget)
        # Never collapse the grid to a single step: aim for >= 4 steps (>= 2x TC count).
        tn_steps = max(1, pl.cdiv(n, 4))
        tn = min(tn_vmem, tn_steps, n)
    if tn < n:
        tn = (tn // 8) * 8                  # (tn, 2) wb block needs tn % 8 == 0 unless tn == n
        if tn < 8:
            tn = min(8, n)
        if tn < n and tn % 8 != 0:
            tn = n
    tn = min(tn, n)
    grid = (pl.cdiv(n, tn),)

    # Advisory cost hint: the kernel is a memory-bound streaming op.
    bytes_accessed = int(2 * x_r.size * itemsize + M.size * 4 + wb.size * 4)
    flops = int(3 * n * cpg * hw + 8 * n * hw)
    transcendentals = int(n * hw)

    out = pl.pallas_call(
        _sge_kernel,
        out_shape=jax.ShapeDtypeStruct((n, cpg, hw), x.dtype),
        grid=grid,
        in_specs=[
            pl.BlockSpec((tn, cpg, hw), lambda i: (i, 0, 0)),   # x tile (lane-dense)
            pl.BlockSpec((cpg, hw), lambda i: (0, 0)),          # M: grid-invariant, stays resident
            pl.BlockSpec((tn, 2), lambda i: (i, 0)),            # merged per-row weight/bias
        ],
        out_specs=pl.BlockSpec((tn, cpg, hw), lambda i: (i, 0, 0)),
        compiler_params=pltpu.CompilerParams(
            dimension_semantics=("parallel",),                  # rows independent -> megacore
            vmem_limit_bytes=vmem_limit,
        ),
        cost_estimate=pl.CostEstimate(
            flops=flops, transcendentals=transcendentals, bytes_accessed=bytes_accessed),
    )(x_r, M, wb)
    return out.reshape(b, c, h, w)


def reference(x, weight, bias, A, mask, groups):
    """Pure-JAX transcription of the torch forward pass for verification."""
    b, c, h, w = x.shape
    xr = x.reshape(b * groups, c // groups, h, w)
    xf = A[None, None] * xr * A.T[None, None]
    xf = xf * mask[None]
    xn = xf.sum(axis=1)
    t = xn.reshape(b * groups, -1)
    t = t - t.mean(axis=1, keepdims=True)
    std = t.std(axis=1, keepdims=True, ddof=1) + 1e-5
    t = t / std
    t = t.reshape(b, groups, h, w)
    t = t * weight.reshape(1, groups, 1, 1) + bias.reshape(1, groups, 1, 1)
    t = t.reshape(b * groups, 1, h, w)
    out = xr * jax.nn.sigmoid(t)
    return out.reshape(b, c, h, w)


if __name__ == "__main__":
    groups = 8
    b = 2
    c = groups * groups          # torch mask broadcast requires c // groups == groups
    h = w = 16                   # h*w = 256 -> lane-dense last dim

    key = jax.random.PRNGKey(0)
    x = jax.random.normal(key, (b, c, h, w), dtype=jnp.float32)

    # Module __init__ uses weight=zeros, bias=ones; use a non-zero weight so the
    # normalization path is actually exercised.
    weight = 0.1 * (jnp.arange(groups, dtype=jnp.float32) + 1.0)
    bias = jnp.ones((groups,), dtype=jnp.float32)

    A, mask = _dct_and_mask(h, groups)

    # Auto tile pick caps rows at cdiv(n, 4) -> tn = 8 here, so the grid has 2 steps
    # even at this small size (exercises the pipelined multi-step path).
    out = spatial_freq_group_enhance(x, weight, bias, A, mask, groups)
    out = jax.block_until_ready(out)

    ref = reference(x, weight, bias, A, mask, groups)
    max_err = float(jnp.max(jnp.abs(out - ref)))
    assert jnp.allclose(out, ref, atol=1e-4, rtol=1e-4), f"max abs err {max_err}"

    print("KERNEL_OK")
</pallas_src>

<mosaic_0001>
module attributes {stable_mosaic.version = 11 : i64} {
  func.func @_sge_kernel(%arg0: i32, %arg1: memref<8x8x256xf32, #tpu.memory_space<vmem>>, %arg2: memref<8x256xf32, #tpu.memory_space<vmem>>, %arg3: memref<8x2xf32, #tpu.memory_space<vmem>>, %arg4: memref<8x8x256xf32, #tpu.memory_space<vmem>>) attributes {dimension_semantics = [#tpu.dimension_semantics<parallel>], iteration_bounds = array<i64: 2>, scalar_prefetch = 0 : i64, scratch_operands = 0 : i64, tpu.core_type = #tpu.core_type<tc>, window_params = [{transform_indices = @transform_0, window_bounds = array<i64: 8, 8, 256>}, {pipeline_mode = #tpu.pipeline_mode<synchronous>, transform_indices = @transform_1, window_bounds = array<i64: 8, 256>}, {transform_indices = @transform_2, window_bounds = array<i64: 8, 2>}, {transform_indices = @transform_3, window_bounds = array<i64: 8, 8, 256>}]} {
    %c0 = arith.constant 0 : index
    %c0_0 = arith.constant 0 : index
    %c0_1 = arith.constant 0 : index
    %0 = vector.load %arg1[%c0, %c0_0, %c0_1] : memref<8x8x256xf32, #tpu.memory_space<vmem>>, vector<8x8x256xf32>
    %c0_2 = arith.constant 0 : index
    %c0_3 = arith.constant 0 : index
    %1 = vector.load %arg2[%c0_2, %c0_3] : memref<8x256xf32, #tpu.memory_space<vmem>>, vector<8x256xf32>
    %2 = vector.extract_strided_slice %0 {offsets = [0, 0, 0], sizes = [8, 1, 256], strides = [1, 1, 1]} : vector<8x8x256xf32> to vector<8x1x256xf32>
    %3 = vector.shape_cast %2 : vector<8x1x256xf32> to vector<8x256xf32>
    %4 = vector.extract_strided_slice %1 {offsets = [0, 0], sizes = [1, 256], strides = [1, 1]} : vector<8x256xf32> to vector<1x256xf32>
    %5 = vector.broadcast %4 : vector<1x256xf32> to vector<8x256xf32>
    %6 = arith.mulf %3, %5 : vector<8x256xf32>
    %7 = vector.extract_strided_slice %0 {offsets = [0, 1, 0], sizes = [8, 1, 256], strides = [1, 1, 1]} : vector<8x8x256xf32> to vector<8x1x256xf32>
    %8 = vector.shape_cast %7 : vector<8x1x256xf32> to vector<8x256xf32>
    %9 = vector.extract_strided_slice %1 {offsets = [1, 0], sizes = [1, 256], strides = [1, 1]} : vector<8x256xf32> to vector<1x256xf32>
    %10 = vector.broadcast %9 : vector<1x256xf32> to vector<8x256xf32>
    %11 = arith.mulf %8, %10 : vector<8x256xf32>
    %12 = arith.addf %6, %11 : vector<8x256xf32>
    %13 = vector.extract_strided_slice %0 {offsets = [0, 2, 0], sizes = [8, 1, 256], strides = [1, 1, 1]} : vector<8x8x256xf32> to vector<8x1x256xf32>
    %14 = vector.shape_cast %13 : vector<8x1x256xf32> to vector<8x256xf32>
    %15 = vector.extract_strided_slice %1 {offsets = [2, 0], sizes = [1, 256], strides = [1, 1]} : vector<8x256xf32> to vector<1x256xf32>
    %16 = vector.broadcast %15 : vector<1x256xf32> to vector<8x256xf32>
    %17 = arith.mulf %14, %16 : vector<8x256xf32>
    %18 = arith.addf %12, %17 : vector<8x256xf32>
    %19 = vector.extract_strided_slice %0 {offsets = [0, 3, 0], sizes = [8, 1, 256], strides = [1, 1, 1]} : vector<8x8x256xf32> to vector<8x1x256xf32>
    %20 = vector.shape_cast %19 : vector<8x1x256xf32> to vector<8x256xf32>
    %21 = vector.extract_strided_slice %1 {offsets = [3, 0], sizes = [1, 256], strides = [1, 1]} : vector<8x256xf32> to vector<1x256xf32>
    %22 = vector.broadcast %21 : vector<1x256xf32> to vector<8x256xf32>
    %23 = arith.mulf %20, %22 : vector<8x256xf32>
    %24 = arith.addf %18, %23 : vector<8x256xf32>
    %25 = vector.extract_strided_slice %0 {offsets = [0, 4, 0], sizes = [8, 1, 256], strides = [1, 1, 1]} : vector<8x8x256xf32> to vector<8x1x256xf32>
    %26 = vector.shape_cast %25 : vector<8x1x256xf32> to vector<8x256xf32>
    %27 = vector.extract_strided_slice %1 {offsets = [4, 0], sizes = [1, 256], strides = [1, 1]} : vector<8x256xf32> to vector<1x256xf32>
    %28 = vector.broadcast %27 : vector<1x256xf32> to vector<8x256xf32>
    %29 = arith.mulf %26, %28 : vector<8x256xf32>
    %30 = arith.addf %24, %29 : vector<8x256xf32>
    %31 = vector.extract_strided_slice %0 {offsets = [0, 5, 0], sizes = [8, 1, 256], strides = [1, 1, 1]} : vector<8x8x256xf32> to vector<8x1x256xf32>
    %32 = vector.shape_cast %31 : vector<8x1x256xf32> to vector<8x256xf32>
    %33 = vector.extract_strided_slice %1 {offsets = [5, 0], sizes = [1, 256], strides = [1, 1]} : vector<8x256xf32> to vector<1x256xf32>
    %34 = vector.broadcast %33 : vector<1x256xf32> to vector<8x256xf32>
    %35 = arith.mulf %32, %34 : vector<8x256xf32>
    %36 = arith.addf %30, %35 : vector<8x256xf32>
    %37 = vector.extract_strided_slice %0 {offsets = [0, 6, 0], sizes = [8, 1, 256], strides = [1, 1, 1]} : vector<8x8x256xf32> to vector<8x1x256xf32>
    %38 = vector.shape_cast %37 : vector<8x1x256xf32> to vector<8x256xf32>
    %39 = vector.extract_strided_slice %1 {offsets = [6, 0], sizes = [1, 256], strides = [1, 1]} : vector<8x256xf32> to vector<1x256xf32>
    %40 = vector.broadcast %39 : vector<1x256xf32> to vector<8x256xf32>
    %41 = arith.mulf %38, %40 : vector<8x256xf32>
    %42 = arith.addf %36, %41 : vector<8x256xf32>
    %43 = vector.extract_strided_slice %0 {offsets = [0, 7, 0], sizes = [8, 1, 256], strides = [1, 1, 1]} : vector<8x8x256xf32> to vector<8x1x256xf32>
    %44 = vector.shape_cast %43 : vector<8x1x256xf32> to vector<8x256xf32>
    %45 = vector.extract_strided_slice %1 {offsets = [7, 0], sizes = [1, 256], strides = [1, 1]} : vector<8x256xf32> to vector<1x256xf32>
    %46 = vector.broadcast %45 : vector<1x256xf32> to vector<8x256xf32>
    %47 = arith.mulf %44, %46 : vector<8x256xf32>
    %48 = arith.addf %42, %47 : vector<8x256xf32>
    %cst = arith.constant dense<0.000000e+00> : vector<8xf32>
    %49 = vector.multi_reduction <add>, %48, %cst [1] : vector<8x256xf32> to vector<8xf32>
    %50 = vector.shape_cast %49 : vector<8xf32> to vector<8x1xf32>
    %51 = arith.mulf %48, %48 : vector<8x256xf32>
    %cst_4 = arith.constant dense<0.000000e+00> : vector<8xf32>
    %52 = vector.multi_reduction <add>, %51, %cst_4 [1] : vector<8x256xf32> to vector<8xf32>
    %53 = vector.shape_cast %52 : vector<8xf32> to vector<8x1xf32>
    %cst_5 = arith.constant 3.906250e-03 : f32
    %54 = vector.broadcast %cst_5 : f32 to vector<8x1xf32>
    %55 = arith.mulf %50, %54 : vector<8x1xf32>
    %56 = arith.mulf %50, %55 : vector<8x1xf32>
    %57 = arith.subf %53, %56 : vector<8x1xf32>
    %cst_6 = arith.constant 0.00392156886 : f32
    %58 = vector.broadcast %cst_6 : f32 to vector<8x1xf32>
    %59 = arith.mulf %57, %58 : vector<8x1xf32>
    %cst_7 = arith.constant 0.000000e+00 : f32
    %60 = vector.broadcast %cst_7 : f32 to vector<8x1xf32>
    %61 = arith.maximumf %59, %60 : vector<8x1xf32>
    %62 = math.sqrt %61 : vector<8x1xf32>
    %cst_8 = arith.constant 9.99999974E-6 : f32
    %63 = vector.broadcast %cst_8 : f32 to vector<8x1xf32>
    %64 = arith.addf %62, %63 : vector<8x1xf32>
    %cst_9 = arith.constant 1.000000e+00 : f32
    %65 = vector.broadcast %cst_9 : f32 to vector<8x1xf32>
    %66 = arith.divf %65, %64 : vector<8x1xf32>
    %c0_10 = arith.constant 0 : index
    %c0_11 = arith.constant 0 : index
    %67 = vector.load %arg3[%c0_10, %c0_11] : memref<8x2xf32, #tpu.memory_space<vmem>>, vector<8x2xf32>
    %68 = vector.extract_strided_slice %67 {offsets = [0, 0], sizes = [8, 1], strides = [1, 1]} : vector<8x2xf32> to vector<8x1xf32>
    %69 = arith.mulf %68, %66 : vector<8x1xf32>
    %70 = vector.extract_strided_slice %67 {offsets = [0, 1], sizes = [8, 1], strides = [1, 1]} : vector<8x2xf32> to vector<8x1xf32>
    %71 = arith.mulf %55, %69 : vector<8x1xf32>
    %72 = arith.subf %70, %71 : vector<8x1xf32>
    %73 = vector.broadcast %69 : vector<8x1xf32> to vector<8x256xf32>
    %74 = arith.mulf %48, %73 : vector<8x256xf32>
    %75 = vector.broadcast %72 : vector<8x1xf32> to vector<8x256xf32>
    %76 = arith.addf %74, %75 : vector<8x256xf32>
    %77 = arith.negf %76 : vector<8x256xf32>
    %78 = math.exp %77 : vector<8x256xf32>
    %cst_12 = arith.constant 1.000000e+00 : f32
    %79 = vector.broadcast %cst_12 : f32 to vector<8x256xf32>
    %80 = arith.addf %79, %78 : vector<8x256xf32>
    %81 = arith.divf %79, %80 : vector<8x256xf32>
    %82 = vector.shape_cast %81 : vector<8x256xf32> to vector<8x1x256xf32>
    %83 = vector.broadcast %82 : vector<8x1x256xf32> to vector<8x8x256xf32>
    %84 = arith.mulf %0, %83 : vector<8x8x256xf32>
    %c0_13 = arith.constant 0 : index
    %c0_14 = arith.constant 0 : index
    %c0_15 = arith.constant 0 : index
    %85 = vector.load %arg4[%c0_13, %c0_14, %c0_15] : memref<8x8x256xf32, #tpu.memory_space<vmem>>, vector<8x8x256xf32>
    tpu.vector_store %arg4[%c0_13, %c0_14, %c0_15], %84 {strides = array<i32>} : memref<8x8x256xf32, #tpu.memory_space<vmem>>, vector<8x8x256xf32>,
    return
  }
  func.func @transform_0(%arg0: i32) -> (i32, i32, i32) {
    %c0_i32 = arith.constant 0 : i32
    %c0_i32_0 = arith.constant 0 : i32
    %c0_i32_1 = arith.constant 0 : i32
    return %arg0, %c0_i32, %c0_i32_0 : i32, i32, i32
  }
  func.func @transform_1(%arg0: i32) -> (i32, i32) {
    %c0_i32 = arith.constant 0 : i32
    %c0_i32_0 = arith.constant 0 : i32
    %c0_i32_1 = arith.constant 0 : i32
    return %c0_i32, %c0_i32_0 : i32, i32
  }
  func.func @transform_2(%arg0: i32) -> (i32, i32) {
    %c0_i32 = arith.constant 0 : i32
    %c0_i32_0 = arith.constant 0 : i32
    return %arg0, %c0_i32 : i32, i32
  }
  func.func @transform_3(%arg0: i32) -> (i32, i32, i32) {
    %c0_i32 = arith.constant 0 : i32
    %c0_i32_0 = arith.constant 0 : i32
    %c0_i32_1 = arith.constant 0 : i32
    return %arg0, %c0_i32, %c0_i32_0 : i32, i32, i32
  }
}

</mosaic_0001>

<bundles_post_ra>
// kernel: tpu_custom_call.1
= control target key start
LH: loop header
LB: loop body
LE: loop exit
PB: predicated region body
PF: predicated region fallthrough
CT: control target
= control target key end

     0   :  { %8 = vsyncpa [#allocation3], 0  ;;  %s2945_s0 = inlined_call_operand.hbm [shape: f32[16,8,256], index: 0, kind: input, shape index: {}]   ;;  %s2946_s1 = inlined_call_operand.vmem [shape: f32[8,256], index: 1, kind: input, shape index: {}]   ;;  %s2947_s2 = inlined_call_operand.vmem [shape: f32[16,2], index: 2, kind: input, shape index: {}]   ;;  %s2948_s3 = inlined_call_operand.hbm [shape: f32[16,8,256], index: 3, kind: output, shape index: {}]  }
   0x1   :  { %10 = vsyncpa [#allocation3 + $0x1], 0 }
   0x2   :  { %11 = vsyncpa [#allocation4], 0 }
   0x3   :  { %13 = vsyncpa [#allocation4 + $0x1], 0  ;;  %s1809_s12 = smov 0   ;;  %s1811_s13 = smov 0  }
   0x4   :  { %s1813_s14 = smov 0   ;;  %s1815_s15 = smov 0  }
   0x5 LB: > { %s1830_s16 = sadd.s32 4294967295, %s1780_s15   ;;  %s1507_s17 = sadd.s32 4294967294, %s1780_s15   ;;  %s1780_s15 = sphi %s1815_s15, %s3095_s15   ;;  %s1776_s14 = sphi %s1813_s14, %s3094_s14   ;;  %s1772_s13 = sphi %s1811_s13, %s3093_s13   ;;  %s1768_s12 = sphi %s1809_s12, %s3092_s12  }
   0x6   : > { %s1834_s18 = sadd.s32 1, %s1780_s15   ;;  %s26_s19 = sadd.s32 1, %s1776_s14 }
   0x7   : > { %s23_s20 = ssub.s32 %s1780_s15, %s1834_s18  ;;  %p33_p0 = scmp.ne.s32.totalorder %s1776_s14, %s1772_s13 }
   0x8   : > { %p24_p1 = scmp.eq.s32.totalorder %s23_s20, 0  ;;  %p34_p2 = scmp.eq.s32.totalorder %s1780_s15, 0 }
   0x9   : > { %p39_p3 = scmp.ne.s32.totalorder %s1772_s13, %s1768_s12  ;;  %p40_p4 = scmp.eq.s32.totalorder %s1830_s16, 0 }
   0xa   : > { %s1846_s21 = scalar_select %p24_p1, %s1776_s14, %s26_s19  }
   0xb   : > { %p1848_p5 = por %p34_p2, %p33_p0  ;;  %p1852_p6 = por %p40_p4, %p39_p3 }
   0xc   : > { %p110_p7 = scmp.eq.s32.totalorder %s1830_s16, 1  ;;  %p116_p8 = scmp.eq.s32.totalorder %s1507_s17, 1 }
   0xd   : > { %p1556_p10 = scmp.lt.s32.totalorder %s1780_s15, 2  ;;  %s139_s26 = sand.u32 1, %s1776_s14  }
   0xe   : > { %p1859_p11 = por %p110_p7, %p33_p0  ;;  %p1863_p12 = por %p116_p8, %p39_p3 }
   0xf   : > { %s1541_s27 = sshll.u32 %s1780_s15, 7  ;;  %s1510_s28 = sshll.u32 %s139_s26, 7 }
  0x10   : > { %s149_s4 = scalar_lea.hbm %s2945_s0, %s1541_s27  ;;  %s143_s6 = scalar_lea.vmem [#allocation2], %s1510_s28 }
  0x11   : > { %s150_s5 = sshll.u32 %s149_s4, 4  ;;  %s152_s7 = sshll.u32 %s143_s6, 4  ;;  %s151_s5 = int_to_ptr.hbm [resolvable:$true] %s150_s5  ;;  %s153_s7 = int_to_ptr.vmem [resolvable:$true] %s152_s7 }
  0x12   : > { %p1874_p13 = pnand %p1556_p10, %p1848_p5  ;;  %p1514_p0 = scmp.ge.s32.totalorder %s1780_s15, 1 }
  0x13   : > { %p167_p1 = scmp.lt.s32.totalorder %s1780_s15, 3  ;;  %s140_s9 = scalar_lea.sflag [#allocation3], %s139_s26 }
  0x14   : > { %s1684_s10 = sshra.s32 %s151_s5, 4  ;;  %p1688_p3 = pneg %p1874_p13  ;;  %s1685_s10 = int_to_ptr.hbm [resolvable:$true] %s1684_s10 }
  0x15   : > { %s1686_s11 = scalar_lea.hbm %s1685_s10, 128  ;;  %s1691_s20 = scalar_lea.hbm %s2945_s0, 256 }
  0x16   : > { %p1687_p2 = scmp.ne.s32.totalorder %s1685_s10, %s1686_s11  ;;  %p1692_p5 = scmp.lt.s32.totalorder %s1685_s10, %s2945_s0 }
  0x17   : > { %p1693_p8 = scmp.lt.s32.totalorder %s1691_s20, %s1686_s11 }
  0x18   : > { %p1689_p4 = pnand %p1688_p3, %p1687_p2 }
  0x19   : > { %p1694_p10 = por %p1693_p8, %p1692_p5 }
  0x1a   : > { %p1690_p7 = pneg %p1689_p4 }
  0x1c   : > { %p1695_p9 = pnand %p1694_p10, %p1690_p7 }
  0x1e   : > { %1698 = shalt.err (!%p1695_p9)
}
  0x1f   : > { %s1782_s26 = smov 256   ;;  %s1783_s28 = smov 16  }
  0x20   : > { %1551 = dma.hbm_to_vmem [thread:$0]  (!%p1874_p13), %s151_s5, 2048, %s153_s7, %s140_s9, %s1782_s26, %s1782_s26, %s1783_s28  }
  0x21   : > { %p168_p2 = pnand %p1514_p0, %p167_p1 }
  0x23   : > { %171 = sbr.rel (%p168_p2) target bundleno = 628 (0x274), region = 32 }
  0x28   : > { %s1895_s29 = sand.u32 1, %s1772_s13  }
  0x29   : > { %s1515_s30 = sshll.u32 %s1895_s29, 7  ;;  %s174_s4 = scalar_lea.sflag [#allocation3], %s1895_s29 }
  0x2a   : > { %s1901_s6 = scalar_lea.vmem [#allocation2], %s1515_s30 }
  0x2b   : > { %1759 = dma.done.wait (%p1852_p6), %s174_s4, 2048  }
  0x2c   : > { %1761 = vsyncadd (%p1852_p6), %s174_s4, 4294965248  ;;  %v1908_v0 = vld [vmem:[%s1901_s6] sm:$0xff]  ;;  %v1918_v2 = vld [vmem:[%s2946_s1 + $0x8] sm:$0xff]  ;;  %vm838_vm0 = vcmask 1041409   ;;  %vm841_vm1 = vcmask 1042434   ;;  %vm844_vm2 = vcmask 1043459  }
  0x2d   : > { %v1913_v1 = vld [vmem:[%s2946_s1] sm:$0xff]  ;;  %2979 = vst [vmem:[#allocation9_spill] sm:$0xff] %v1918_v2  ;;  %v1921_v3 = vld [vmem:[%s1901_s6 + $0x8] sm:$0xff]  ;;  %v1924_v4 = vld [vmem:[%s1901_s6 + $0x10] sm:$0xff]  ;;  %v230_v7 = vperm.slane %v1918_v2, 0  ;;  %v248_v11 = vperm.slane %v1918_v2, 1 }
  0x2e   : > { %2978 = vst [vmem:[#allocation8_spill] sm:$0xff] %v1913_v1  ;;  %v1927_v5 = vld [vmem:[%s1901_s6 + $0x18] sm:$0xff]  ;;  %v229_v6 = vperm.slane %v1913_v1, 0  ;;  %v247_v8 = vperm.slane %v1913_v1, 1  ;;  %v1933_v9 = vld [vmem:[%s1901_s6 + $0x20] sm:$0xff]  ;;  %v1936_v10 = vld [vmem:[%s1901_s6 + $0x28] sm:$0xff] }
  0x2f   : > { %v1940_v12 = vperm.slane %v1913_v1, 2  ;;  %v1943_v13 = vperm.slane %v1918_v2, 2  ;;  %v1946_v14 = vperm.slane %v1913_v1, 3  ;;  %v1949_v15 = vld [vmem:[%s1901_s6 + $0x30] sm:$0xff]  ;;  %v1952_v16 = vld [vmem:[%s1901_s6 + $0x38] sm:$0xff]  ;;  %v1955_v17 = vld [vmem:[%s1901_s6 + $0x40] sm:$0xff]  ;;  %v232_v19 = vmul.f32 %v230_v7, %v1921_v3 }
  0x30   : > { %v231_v18 = vmul.f32 %v229_v6, %v1908_v0  ;;  %v233_v20 = vmul.f32 %v229_v6, %v1924_v4  ;;  %v1961_v21 = vperm.slane %v1918_v2, 3  ;;  %v1964_v22 = vld [vmem:[%s1901_s6 + $0x48] sm:$0xff]  ;;  %v1967_v23 = vld [vmem:[%s1901_s6 + $0x50] sm:$0xff]  ;;  %v1970_v24 = vld [vmem:[%s1901_s6 + $0x58] sm:$0xff]  ;;  %v234_v25 = vmul.f32 %v230_v7, %v1927_v5  ;;  %p206_p6 = scmp.lt.s32.totalorder %s1830_s16, 1  ;;  %s1785_s20 = smov 1  }
  0x31   : > { %2980 = vst [vmem:[#allocation10_spill] sm:$0xff] %v1946_v14  ;;  %v235_v26 = vmul.f32 %v229_v6, %v1933_v9  ;;  %v236_v27 = vmul.f32 %v230_v7, %v1936_v10  ;;  %v237_v28 = vmul.f32 %v229_v6, %v1949_v15  ;;  %v1977_v29 = vld [vmem:[%s1901_s6 + $0x60] sm:$0xff]  ;;  %v1980_v30 = vld [vmem:[%s1901_s6 + $0x68] sm:$0xff]  ;;  %v1983_v31 = vld [vmem:[%s1901_s6 + $0x70] sm:$0xff]  ;;  %v238_v32 = vmul.f32 %v230_v7, %v1952_v16  ;;  %s2865_s22 = scalar_lea.vmem [#allocation5], %s1515_s30  ;;  %s1543_s27 = sshll.u32 %s1830_s16, 7 }
  0x32   : > { %2981 = vst [vmem:[#allocation11_spill] sm:$0xff] %v1961_v21  ;;  %v239_v33 = vmul.f32 %v229_v6, %v1955_v17  ;;  %v240_v34 = vmul.f32 %v230_v7, %v1964_v22  ;;  %v241_v35 = vmul.f32 %v229_v6, %v1967_v23  ;;  %v1990_v36 = vld [vmem:[%s1901_s6 + $0x78] sm:$0xff]  ;;  %v242_v37 = vmul.f32 %v230_v7, %v1970_v24  ;;  %s207_s23 = scalar_select %p206_p6, %s1830_s16, 1 }
  0x33   : > { %2982 = vst [vmem:[#allocation12_spill] sm:$0xff] %v1964_v22  ;;  %v243_v38 = vmul.f32 %v229_v6, %v1977_v29  ;;  %v244_v39 = vmul.f32 %v230_v7, %v1980_v30  ;;  %v245_v40 = vmul.f32 %v229_v6, %v1983_v31  ;;  %v246_v41 = vmul.f32 %v230_v7, %v1990_v36  ;;  %s1418_s28 = scalar_lea.hbm %s2948_s3, %s1543_s27  ;;  %s1419_s30 = sshll.u32 %s2865_s22, 4  ;;  %s1420_s30 = int_to_ptr.vmem [resolvable:$true] %s1419_s30 }
  0x34   : > { %2983 = vst [vmem:[#allocation13_spill] sm:$0xff] %v1967_v23  ;;  %v249_v42 = vmul.f32 %v247_v8, %v1908_v0  ;;  %v250_v43 = vmul.f32 %v248_v11, %v1921_v3  ;;  %v251_v44 = vmul.f32 %v247_v8, %v1924_v4  ;;  %v252_v45 = vmul.f32 %v248_v11, %v1927_v5  ;;  %s1517_s10 = sshll.u32 %s207_s23, 3  ;;  %s1421_s4 = sshll.u32 %s1418_s28, 4  ;;  %s1422_s4 = int_to_ptr.hbm [resolvable:$true] %s1421_s4 }
  0x35   : > { %2984 = vst [vmem:[#allocation14_spill] sm:$0xff] %v1970_v24  ;;  %v253_v46 = vmul.f32 %v247_v8, %v1933_v9  ;;  %v254_v47 = vmul.f32 %v248_v11, %v1936_v10  ;;  %v255_v48 = vmul.f32 %v247_v8, %v1949_v15  ;;  %v256_v49 = vmul.f32 %v248_v11, %v1952_v16  ;;  %s209_s19 = scalar_lea.vmem %s2947_s2, %s1517_s10  ;;  %s1406_s5 = scalar_lea.sflag [#allocation4], %s1895_s29 }
  0x36   : > { %2985 = vst [vmem:[#allocation15_spill] sm:$0xff] %v1977_v29  ;;  %v257_v50 = vmul.f32 %v247_v8, %v1955_v17  ;;  %v258_v51 = vmul.f32 %v248_v11, %v1964_v22  ;;  %v259_v52 = vmul.f32 %v247_v8, %v1967_v23  ;;  %v260_v53 = vmul.f32 %v248_v11, %v1970_v24  ;;  %s1728_s7 = sshra.s32 %s1422_s4, 4  ;;  %s1729_s7 = int_to_ptr.hbm [resolvable:$true] %s1728_s7 }
  0x37   : > { %2986 = vst [vmem:[#allocation16_spill] sm:$0xff] %v1980_v30  ;;  %v261_v54 = vmul.f32 %v247_v8, %v1977_v29  ;;  %v262_v55 = vmul.f32 %v248_v11, %v1980_v30  ;;  %v263_v56 = vmul.f32 %v247_v8, %v1983_v31  ;;  %v264_v57 = vmul.f32 %v248_v11, %v1990_v36  ;;  %s1730_s8 = scalar_lea.hbm %s1729_s7, 128  ;;  %p1735_p1 = scmp.lt.s32.totalorder %s1729_s7, %s2948_s3 }
  0x38   : > { %2987 = vst [vmem:[#allocation17_spill] sm:$0xff] %v1983_v31  ;;  %v281_v58 = vrot.slane %v249_v42, 1  ;;  %v282_v59 = vrot.slane %v250_v43, 1  ;;  %v283_v60 = vrot.slane %v251_v44, 1  ;;  %v284_v61 = vrot.slane %v252_v45, 1  ;;  %p1731_p9 = scmp.ne.s32.totalorder %s1729_s7, %s1730_s8 }
  0x39   : > { %v285_v62 = vrot.slane %v253_v46, 1  ;;  %v286_v63 = vrot.slane %v254_v47, 1  ;;  %v287_v6 = vrot.slane %v255_v48, 1  ;;  %v288_v7 = vrot.slane %v256_v49, 1 }
  0x3a   : > { %v289_v2 = vrot.slane %v257_v50, 1  ;;  %v290_v1 = vrot.slane %v258_v51, 1  ;;  %v291_v21 = vrot.slane %v259_v52, 1  ;;  %v292_v14 = vrot.slane %v260_v53, 1  ;;  %p1732_p13 = pnand %p1731_p9, %p1859_p11 }
  0x3b   : > { %v293_v24 = vrot.slane %v261_v54, 1  ;;  %v294_v29 = vrot.slane %v262_v55, 1  ;;  %v295_v23 = vrot.slane %v263_v56, 1  ;;  %v296_v30 = vrot.slane %v264_v57, 1 }
  0x3c   : > { %v313_v22 = vadd.f32 %v281_v58, %v231_v18  ;;  %v314_v8 = vadd.f32 %v282_v59, %v232_v19  ;;  %v315_v31 = vadd.f32 %v283_v60, %v233_v20  ;;  %v316_v11 = vadd.f32 %v284_v61, %v234_v25  ;;  %p1733_p0 = pneg %p1732_p13 }
  0x3d   : > { %v317_v42 = vadd.f32 %v285_v62, %v235_v26  ;;  %v318_v43 = vadd.f32 %v286_v63, %v236_v27  ;;  %v319_v44 = vadd.f32 %v287_v6, %v237_v28  ;;  %v320_v45 = vadd.f32 %v288_v7, %v238_v32  ;;  %v2989_v26 = vld [vmem:[#allocation13_spill] sm:$0xff]  ;;  %v2990_v28 = vld [vmem:[#allocation14_spill] sm:$0xff] }
  0x3e   : > { %v321_v46 = vadd.f32 %v289_v2, %v239_v33  ;;  %v322_v47 = vadd.f32 %v290_v1, %v240_v34  ;;  %v323_v48 = vadd.f32 %v291_v21, %v241_v35  ;;  %v324_v49 = vadd.f32 %v292_v14, %v242_v37  ;;  %v2992_v33 = vld [vmem:[#allocation16_spill] sm:$0xff] }
  0x3f   : > { %v325_v50 = vadd.f32 %v293_v24, %v243_v38  ;;  %v326_v51 = vadd.f32 %v294_v29, %v244_v39  ;;  %v327_v52 = vadd.f32 %v295_v23, %v245_v40  ;;  %v328_v53 = vadd.f32 %v296_v30, %v246_v41  ;;  %v2988_v24 = vld [vmem:[#allocation12_spill] sm:$0xff]  ;;  %v2991_v30 = vld [vmem:[#allocation15_spill] sm:$0xff]  ;;  %v2993_v35 = vld [vmem:[#allocation17_spill] sm:$0xff] }
  0x40   : > { %v331_v54 = vmul.f32 %v1940_v12, %v1908_v0  ;;  %v332_v18 = vmul.f32 %v1943_v13, %v1921_v3  ;;  %v333_v19 = vmul.f32 %v1940_v12, %v1924_v4  ;;  %v334_v20 = vmul.f32 %v1943_v13, %v1927_v5 }
  0x41   : > { %v335_v1 = vmul.f32 %v1940_v12, %v1933_v9  ;;  %v336_v2 = vmul.f32 %v1943_v13, %v1936_v10  ;;  %v337_v14 = vmul.f32 %v1940_v12, %v1949_v15  ;;  %v338_v21 = vmul.f32 %v1943_v13, %v1952_v16 }
  0x42   : > { %v339_v23 = vmul.f32 %v1940_v12, %v1955_v17  ;;  %v340_v25 = vmul.f32 %v1943_v13, %v2988_v24  ;;  %v341_v27 = vmul.f32 %v1940_v12, %v2989_v26  ;;  %v342_v29 = vmul.f32 %v1943_v13, %v2990_v28 }
  0x43   : > { %v343_v32 = vmul.f32 %v1940_v12, %v2991_v30  ;;  %v344_v34 = vmul.f32 %v1943_v13, %v2992_v33  ;;  %v345_v37 = vmul.f32 %v1940_v12, %v2993_v35  ;;  %v346_v38 = vmul.f32 %v1943_v13, %v1990_v36 }
  0x44   : > { %v363_v39 = vrot.slane %v331_v54, 2  ;;  %v364_v40 = vrot.slane %v332_v18, 2  ;;  %v365_v41 = vrot.slane %v333_v19, 2  ;;  %v366_v55 = vrot.slane %v334_v20, 2 }
  0x45   : > { %v367_v56 = vrot.slane %v335_v1, 2  ;;  %v368_v57 = vrot.slane %v336_v2, 2  ;;  %v369_v58 = vrot.slane %v337_v14, 2  ;;  %v370_v59 = vrot.slane %v338_v21, 2 }
  0x46   : > { %v371_v60 = vrot.slane %v339_v23, 2  ;;  %v372_v61 = vrot.slane %v340_v25, 2  ;;  %v373_v62 = vrot.slane %v341_v27, 2  ;;  %v374_v63 = vrot.slane %v342_v29, 2 }
  0x47   : > { %v375_v6 = vrot.slane %v343_v32, 2  ;;  %v376_v7 = vrot.slane %v344_v34, 2  ;;  %v377_v33 = vrot.slane %v345_v37, 2  ;;  %v378_v30 = vrot.slane %v346_v38, 2  ;;  %v2994_v32 = vld [vmem:[#allocation10_spill] sm:$0xff] }
  0x48   : > { %v395_v12 = vadd.f32 %v363_v39, %v313_v22  ;;  %v396_v35 = vadd.f32 %v364_v40, %v314_v8  ;;  %v397_v28 = vadd.f32 %v365_v41, %v315_v31  ;;  %v398_v13 = vadd.f32 %v366_v55, %v316_v11  ;;  %v2995_v22 = vld [vmem:[#allocation11_spill] sm:$0xff] }
  0x49   : > { %v399_v54 = vadd.f32 %v367_v56, %v317_v42  ;;  %v400_v18 = vadd.f32 %v368_v57, %v318_v43  ;;  %v401_v19 = vadd.f32 %v369_v58, %v319_v44  ;;  %v402_v20 = vadd.f32 %v370_v59, %v320_v45 }
  0x4a   : > { %v403_v1 = vadd.f32 %v371_v60, %v321_v46  ;;  %v404_v2 = vadd.f32 %v372_v61, %v322_v47  ;;  %v405_v14 = vadd.f32 %v373_v62, %v323_v48  ;;  %v406_v21 = vadd.f32 %v374_v63, %v324_v49  ;;  %v2996_v49 = vld [vmem:[#allocation14_spill] sm:$0xff] }
  0x4b   : > { %v407_v23 = vadd.f32 %v375_v6, %v325_v50  ;;  %v408_v25 = vadd.f32 %v376_v7, %v326_v51  ;;  %v409_v27 = vadd.f32 %v377_v33, %v327_v52  ;;  %v410_v29 = vadd.f32 %v378_v30, %v328_v53  ;;  %v2997_v51 = vld [vmem:[#allocation15_spill] sm:$0xff]  ;;  %v2998_v53 = vld [vmem:[#allocation16_spill] sm:$0xff]  ;;  %v2999_v33 = vld [vmem:[#allocation17_spill] sm:$0xff] }
  0x4c   : > { %v413_v34 = vmul.f32 %v2994_v32, %v1908_v0  ;;  %v414_v8 = vmul.f32 %v2995_v22, %v1921_v3  ;;  %v415_v31 = vmul.f32 %v2994_v32, %v1924_v4  ;;  %v416_v11 = vmul.f32 %v2995_v22, %v1927_v5 }
  0x4d   : > { %v417_v42 = vmul.f32 %v2994_v32, %v1933_v9  ;;  %v418_v43 = vmul.f32 %v2995_v22, %v1936_v10  ;;  %v419_v44 = vmul.f32 %v2994_v32, %v1949_v15  ;;  %v420_v45 = vmul.f32 %v2995_v22, %v1952_v16 }
  0x4e   : > { %v421_v46 = vmul.f32 %v2994_v32, %v1955_v17  ;;  %v422_v47 = vmul.f32 %v2995_v22, %v2988_v24  ;;  %v423_v48 = vmul.f32 %v2994_v32, %v2989_v26  ;;  %v424_v50 = vmul.f32 %v2995_v22, %v2996_v49 }
  0x4f   : > { %v425_v52 = vmul.f32 %v2994_v32, %v2997_v51  ;;  %v426_v30 = vmul.f32 %v2995_v22, %v2998_v53  ;;  %v427_v37 = vmul.f32 %v2994_v32, %v2999_v33  ;;  %v428_v38 = vmul.f32 %v2995_v22, %v1990_v36 }
  0x50   : > { %v445_v39 = vrot.slane %v413_v34, 3  ;;  %v446_v40 = vrot.slane %v414_v8, 3  ;;  %v447_v41 = vrot.slane %v415_v31, 3  ;;  %v448_v55 = vrot.slane %v416_v11, 3 }
  0x51   : > { %v449_v56 = vrot.slane %v417_v42, 3  ;;  %v450_v57 = vrot.slane %v418_v43, 3  ;;  %v451_v58 = vrot.slane %v419_v44, 3  ;;  %v452_v59 = vrot.slane %v420_v45, 3 }
  0x52   : > { %v453_v60 = vrot.slane %v421_v46, 3  ;;  %v454_v61 = vrot.slane %v422_v47, 3  ;;  %v455_v62 = vrot.slane %v423_v48, 3  ;;  %v456_v63 = vrot.slane %v424_v50, 3 }
  0x53   : > { %v457_v6 = vrot.slane %v425_v52, 3  ;;  %v458_v7 = vrot.slane %v426_v30, 3  ;;  %v459_v53 = vrot.slane %v427_v37, 3  ;;  %v460_v51 = vrot.slane %v428_v38, 3  ;;  %v3000_v52 = vld [vmem:[#allocation8_spill] sm:$0xff]  ;;  %v3001_v37 = vld [vmem:[#allocation9_spill] sm:$0xff] }
  0x54   : > { %v477_v32 = vadd.f32 %v445_v39, %v395_v12  ;;  %v478_v33 = vadd.f32 %v446_v40, %v396_v35  ;;  %v479_v49 = vadd.f32 %v447_v41, %v397_v28  ;;  %v480_v22 = vadd.f32 %v448_v55, %v398_v13  ;;  %v3007_v40 = vld [vmem:[#allocation15_spill] sm:$0xff]  ;;  %v3008_v55 = vld [vmem:[#allocation16_spill] sm:$0xff] }
  0x55   : > { %v481_v34 = vadd.f32 %v449_v56, %v399_v54  ;;  %v482_v8 = vadd.f32 %v450_v57, %v400_v18  ;;  %v483_v31 = vadd.f32 %v451_v58, %v401_v19  ;;  %v484_v11 = vadd.f32 %v452_v59, %v402_v20  ;;  %v3009_v57 = vld [vmem:[#allocation17_spill] sm:$0xff] }
  0x56   : > { %v485_v42 = vadd.f32 %v453_v60, %v403_v1  ;;  %v486_v43 = vadd.f32 %v454_v61, %v404_v2  ;;  %v487_v44 = vadd.f32 %v455_v62, %v405_v14  ;;  %v488_v45 = vadd.f32 %v456_v63, %v406_v21 }
  0x57   : > { %v489_v46 = vadd.f32 %v457_v6, %v407_v23  ;;  %v490_v47 = vadd.f32 %v458_v7, %v408_v25  ;;  %v491_v48 = vadd.f32 %v459_v53, %v409_v27  ;;  %v492_v50 = vadd.f32 %v460_v51, %v410_v29  ;;  %v3006_v53 = vld [vmem:[#allocation14_spill] sm:$0xff] }
  0x58   : > { %v493_v30 = vperm.slane %v3000_v52, 4  ;;  %v494_v38 = vperm.slane %v3001_v37, 4  ;;  %v2080_v35 = vperm.slane %v3000_v52, 5  ;;  %v2083_v28 = vperm.slane %v3001_v37, 5 }
  0x59   : > { %v2086_v12 = vperm.slane %v3000_v52, 6  ;;  %v2089_v13 = vperm.slane %v3001_v37, 6  ;;  %v2092_v54 = vperm.slane %v3000_v52, 7  ;;  %v2098_v1 = vperm.slane %v3001_v37, 7 }
  0x5a   : > { %v495_v18 = vmul.f32 %v493_v30, %v1908_v0  ;;  %v496_v19 = vmul.f32 %v494_v38, %v1921_v3  ;;  %v497_v20 = vmul.f32 %v493_v30, %v1924_v4  ;;  %v498_v2 = vmul.f32 %v494_v38, %v1927_v5 }
  0x5b   : > { %3002 = vst [vmem:[#allocation10_spill] sm:$0xff] %v2086_v12  ;;  %v499_v14 = vmul.f32 %v493_v30, %v1933_v9  ;;  %v500_v21 = vmul.f32 %v494_v38, %v1936_v10  ;;  %v501_v23 = vmul.f32 %v493_v30, %v1949_v15  ;;  %v502_v25 = vmul.f32 %v494_v38, %v1952_v16 }
  0x5c   : > { %3003 = vst [vmem:[#allocation11_spill] sm:$0xff] %v2089_v13  ;;  %v503_v27 = vmul.f32 %v493_v30, %v1955_v17  ;;  %v504_v29 = vmul.f32 %v494_v38, %v2988_v24  ;;  %v505_v51 = vmul.f32 %v493_v30, %v2989_v26  ;;  %v506_v39 = vmul.f32 %v494_v38, %v3006_v53 }
  0x5d   : > { %3004 = vst [vmem:[#allocation8_spill] sm:$0xff] %v2092_v54  ;;  %v507_v41 = vmul.f32 %v493_v30, %v3007_v40  ;;  %v508_v56 = vmul.f32 %v494_v38, %v3008_v55  ;;  %v509_v58 = vmul.f32 %v493_v30, %v3009_v57  ;;  %v510_v59 = vmul.f32 %v494_v38, %v1990_v36 }
  0x5e   : > { %3005 = vst [vmem:[#allocation9_spill] sm:$0xff] %v2098_v1  ;;  %v527_v60 = vrot.slane %v495_v18, 4  ;;  %v528_v61 = vrot.slane %v496_v19, 4  ;;  %v529_v62 = vrot.slane %v497_v20, 4  ;;  %v530_v63 = vrot.slane %v498_v2, 4 }
  0x5f   : > { %v531_v6 = vrot.slane %v499_v14, 4  ;;  %v532_v7 = vrot.slane %v500_v21, 4  ;;  %v533_v52 = vrot.slane %v501_v23, 4  ;;  %v534_v37 = vrot.slane %v502_v25, 4 }
  0x60   : > { %v535_v1 = vrot.slane %v503_v27, 4  ;;  %v536_v54 = vrot.slane %v504_v29, 4  ;;  %v537_v13 = vrot.slane %v505_v51, 4  ;;  %v538_v12 = vrot.slane %v506_v39, 4 }
  0x61   : > { %v539_v53 = vrot.slane %v507_v41, 4  ;;  %v540_v40 = vrot.slane %v508_v56, 4  ;;  %v541_v26 = vrot.slane %v509_v58, 4  ;;  %v542_v55 = vrot.slane %v510_v59, 4 }
  0x62   : > { %v559_v24 = vadd.f32 %v527_v60, %v477_v32  ;;  %v560_v30 = vadd.f32 %v528_v61, %v478_v33  ;;  %v561_v57 = vadd.f32 %v529_v62, %v479_v49  ;;  %v562_v38 = vadd.f32 %v530_v63, %v480_v22 }
  0x63   : > { %v563_v18 = vadd.f32 %v531_v6, %v481_v34  ;;  %v564_v19 = vadd.f32 %v532_v7, %v482_v8  ;;  %v565_v20 = vadd.f32 %v533_v52, %v483_v31  ;;  %v566_v2 = vadd.f32 %v534_v37, %v484_v11  ;;  %v3010_v11 = vld [vmem:[#allocation12_spill] sm:$0xff] }
  0x64   : > { %v567_v14 = vadd.f32 %v535_v1, %v485_v42  ;;  %v568_v21 = vadd.f32 %v536_v54, %v486_v43  ;;  %v569_v23 = vadd.f32 %v537_v13, %v487_v44  ;;  %v570_v25 = vadd.f32 %v538_v12, %v488_v45  ;;  %v3011_v43 = vld [vmem:[#allocation13_spill] sm:$0xff]  ;;  %v3012_v45 = vld [vmem:[#allocation14_spill] sm:$0xff] }
  0x65   : > { %v571_v27 = vadd.f32 %v539_v53, %v489_v46  ;;  %v572_v29 = vadd.f32 %v540_v40, %v490_v47  ;;  %v573_v51 = vadd.f32 %v541_v26, %v491_v48  ;;  %v574_v39 = vadd.f32 %v542_v55, %v492_v50  ;;  %v3013_v47 = vld [vmem:[#allocation15_spill] sm:$0xff]  ;;  %v3014_v50 = vld [vmem:[#allocation16_spill] sm:$0xff]  ;;  %v3015_v13 = vld [vmem:[#allocation17_spill] sm:$0xff] }
  0x66   : > { %v577_v41 = vmul.f32 %v2080_v35, %v1908_v0  ;;  %v578_v33 = vmul.f32 %v2083_v28, %v1921_v3  ;;  %v579_v49 = vmul.f32 %v2080_v35, %v1924_v4  ;;  %v580_v32 = vmul.f32 %v2083_v28, %v1927_v5 }
  0x67   : > { %v581_v22 = vmul.f32 %v2080_v35, %v1933_v9  ;;  %v582_v34 = vmul.f32 %v2083_v28, %v1936_v10  ;;  %v583_v26 = vmul.f32 %v2080_v35, %v1949_v15  ;;  %v584_v8 = vmul.f32 %v2083_v28, %v1952_v16 }
  0x68   : > { %v585_v31 = vmul.f32 %v2080_v35, %v1955_v17  ;;  %v586_v42 = vmul.f32 %v2083_v28, %v3010_v11  ;;  %v587_v44 = vmul.f32 %v2080_v35, %v3011_v43  ;;  %v588_v46 = vmul.f32 %v2083_v28, %v3012_v45 }
  0x69   : > { %v589_v48 = vmul.f32 %v2080_v35, %v3013_v47  ;;  %v590_v12 = vmul.f32 %v2083_v28, %v3014_v50  ;;  %v591_v54 = vmul.f32 %v2080_v35, %v3015_v13  ;;  %v592_v1 = vmul.f32 %v2083_v28, %v1990_v36 }
  0x6a   : > { %v609_v53 = vrot.slane %v577_v41, 5  ;;  %v610_v40 = vrot.slane %v578_v33, 5  ;;  %v611_v55 = vrot.slane %v579_v49, 5  ;;  %v612_v56 = vrot.slane %v580_v32, 5 }
  0x6b   : > { %v613_v58 = vrot.slane %v581_v22, 5  ;;  %v614_v59 = vrot.slane %v582_v34, 5  ;;  %v615_v60 = vrot.slane %v583_v26, 5  ;;  %v616_v61 = vrot.slane %v584_v8, 5 }
  0x6c   : > { %v617_v62 = vrot.slane %v585_v31, 5  ;;  %v618_v63 = vrot.slane %v586_v42, 5  ;;  %v619_v6 = vrot.slane %v587_v44, 5  ;;  %v620_v7 = vrot.slane %v588_v46, 5 }
  0x6d   : > { %v621_v52 = vrot.slane %v589_v48, 5  ;;  %v622_v37 = vrot.slane %v590_v12, 5  ;;  %v623_v50 = vrot.slane %v591_v54, 5  ;;  %v624_v47 = vrot.slane %v592_v1, 5  ;;  %v3016_v48 = vld [vmem:[#allocation10_spill] sm:$0xff] }
  0x6e   : > { %v641_v35 = vadd.f32 %v609_v53, %v559_v24  ;;  %v642_v13 = vadd.f32 %v610_v40, %v560_v30  ;;  %v643_v45 = vadd.f32 %v611_v55, %v561_v57  ;;  %v644_v28 = vadd.f32 %v612_v56, %v562_v38  ;;  %v3017_v24 = vld [vmem:[#allocation11_spill] sm:$0xff] }
  0x6f   : > { %v645_v41 = vadd.f32 %v613_v58, %v563_v18  ;;  %v646_v33 = vadd.f32 %v614_v59, %v564_v19  ;;  %v647_v49 = vadd.f32 %v615_v60, %v565_v20  ;;  %v648_v32 = vadd.f32 %v616_v61, %v566_v2 }
  0x70   : > { %v649_v22 = vadd.f32 %v617_v62, %v567_v14  ;;  %v650_v34 = vadd.f32 %v618_v63, %v568_v21  ;;  %v651_v26 = vadd.f32 %v619_v6, %v569_v23  ;;  %v652_v8 = vadd.f32 %v620_v7, %v570_v25  ;;  %v3018_v25 = vld [vmem:[#allocation14_spill] sm:$0xff] }
  0x71   : > { %v653_v31 = vadd.f32 %v621_v52, %v571_v27  ;;  %v654_v42 = vadd.f32 %v622_v37, %v572_v29  ;;  %v655_v44 = vadd.f32 %v623_v50, %v573_v51  ;;  %v656_v46 = vadd.f32 %v624_v47, %v574_v39  ;;  %v3019_v29 = vld [vmem:[#allocation15_spill] sm:$0xff]  ;;  %v3020_v39 = vld [vmem:[#allocation16_spill] sm:$0xff]  ;;  %v3021_v50 = vld [vmem:[#allocation17_spill] sm:$0xff] }
  0x72   : > { %v659_v12 = vmul.f32 %v3016_v48, %v1908_v0  ;;  %v660_v30 = vmul.f32 %v3017_v24, %v1921_v3  ;;  %v661_v57 = vmul.f32 %v3016_v48, %v1924_v4  ;;  %v662_v38 = vmul.f32 %v3017_v24, %v1927_v5 }
  0x73   : > { %v663_v18 = vmul.f32 %v3016_v48, %v1933_v9  ;;  %v664_v19 = vmul.f32 %v3017_v24, %v1936_v10  ;;  %v665_v20 = vmul.f32 %v3016_v48, %v1949_v15  ;;  %v666_v2 = vmul.f32 %v3017_v24, %v1952_v16 }
  0x74   : > { %v667_v14 = vmul.f32 %v3016_v48, %v1955_v17  ;;  %v668_v21 = vmul.f32 %v3017_v24, %v3010_v11  ;;  %v669_v23 = vmul.f32 %v3016_v48, %v3011_v43  ;;  %v670_v27 = vmul.f32 %v3017_v24, %v3018_v25 }
  0x75   : > { %v671_v51 = vmul.f32 %v3016_v48, %v3019_v29  ;;  %v672_v47 = vmul.f32 %v3017_v24, %v3020_v39  ;;  %v673_v54 = vmul.f32 %v3016_v48, %v3021_v50  ;;  %v674_v1 = vmul.f32 %v3017_v24, %v1990_v36 }
  0x76   : > { %v691_v53 = vrot.slane %v659_v12, 6  ;;  %v692_v40 = vrot.slane %v660_v30, 6  ;;  %v693_v55 = vrot.slane %v661_v57, 6  ;;  %v694_v56 = vrot.slane %v662_v38, 6 }
  0x77   : > { %v695_v58 = vrot.slane %v663_v18, 6  ;;  %v696_v59 = vrot.slane %v664_v19, 6  ;;  %v697_v60 = vrot.slane %v665_v20, 6  ;;  %v698_v61 = vrot.slane %v666_v2, 6 }
  0x78   : > { %v699_v62 = vrot.slane %v667_v14, 6  ;;  %v700_v63 = vrot.slane %v668_v21, 6  ;;  %v701_v6 = vrot.slane %v669_v23, 6  ;;  %v702_v7 = vrot.slane %v670_v27, 6 }
  0x79   : > { %v703_v52 = vrot.slane %v671_v51, 6  ;;  %v704_v37 = vrot.slane %v672_v47, 6  ;;  %v705_v39 = vrot.slane %v673_v54, 6  ;;  %v706_v29 = vrot.slane %v674_v1, 6  ;;  %v3022_v51 = vld [vmem:[#allocation8_spill] sm:$0xff] }
  0x7a   : > { %v723_v48 = vadd.f32 %v691_v53, %v641_v35  ;;  %v724_v50 = vadd.f32 %v692_v40, %v642_v13  ;;  %v725_v25 = vadd.f32 %v693_v55, %v643_v45  ;;  %v726_v24 = vadd.f32 %v694_v56, %v644_v28  ;;  %v3023_v35 = vld [vmem:[#allocation9_spill] sm:$0xff] }
  0x7b   : > { %v727_v12 = vadd.f32 %v695_v58, %v645_v41  ;;  %v728_v30 = vadd.f32 %v696_v59, %v646_v33  ;;  %v729_v57 = vadd.f32 %v697_v60, %v647_v49  ;;  %v730_v38 = vadd.f32 %v698_v61, %v648_v32  ;;  %v3024_v32 = vld [vmem:[#allocation14_spill] sm:$0xff] }
  0x7c   : > { %v731_v18 = vadd.f32 %v699_v62, %v649_v22  ;;  %v732_v19 = vadd.f32 %v700_v63, %v650_v34  ;;  %v733_v20 = vadd.f32 %v701_v6, %v651_v26  ;;  %v734_v2 = vadd.f32 %v702_v7, %v652_v8  ;;  %v3025_v22 = vld [vmem:[#allocation15_spill] sm:$0xff]  ;;  %v3026_v34 = vld [vmem:[#allocation16_spill] sm:$0xff]  ;;  %v3027_v26 = vld [vmem:[#allocation17_spill] sm:$0xff] }
  0x7d   : > { %v735_v14 = vadd.f32 %v703_v52, %v653_v31  ;;  %v736_v21 = vadd.f32 %v704_v37, %v654_v42  ;;  %v737_v23 = vadd.f32 %v705_v39, %v655_v44  ;;  %v738_v27 = vadd.f32 %v706_v29, %v656_v46 }
  0x7e   : > { %v741_v47 = vmul.f32 %v3022_v51, %v1908_v0  ;;  %v742_v13 = vmul.f32 %v3023_v35, %v1921_v3  ;;  %v743_v45 = vmul.f32 %v3022_v51, %v1924_v4  ;;  %v744_v28 = vmul.f32 %v3023_v35, %v1927_v5 }
  0x7f   : > { %v745_v41 = vmul.f32 %v3022_v51, %v1933_v9  ;;  %v746_v33 = vmul.f32 %v3023_v35, %v1936_v10  ;;  %v747_v49 = vmul.f32 %v3022_v51, %v1949_v15  ;;  %v748_v0 = vmul.f32 %v3023_v35, %v1952_v16 }
  0x80   : > { %v749_v3 = vmul.f32 %v3022_v51, %v1955_v17  ;;  %v750_v4 = vmul.f32 %v3023_v35, %v3010_v11  ;;  %v751_v5 = vmul.f32 %v3022_v51, %v3011_v43  ;;  %v752_v9 = vmul.f32 %v3023_v35, %v3024_v32 }
  0x81   : > { %v753_v10 = vmul.f32 %v3022_v51, %v3025_v22  ;;  %v754_v15 = vmul.f32 %v3023_v35, %v3026_v34  ;;  %v755_v16 = vmul.f32 %v3022_v51, %v3027_v26  ;;  %v756_v17 = vmul.f32 %v3023_v35, %v1990_v36 }
  0x82   : > { %v773_v8 = vrot.slane %v741_v47, 7  ;;  %v774_v11 = vrot.slane %v742_v13, 7  ;;  %v775_v31 = vrot.slane %v743_v45, 7  ;;  %v776_v42 = vrot.slane %v744_v28, 7 }
  0x83   : > { %v777_v43 = vrot.slane %v745_v41, 7  ;;  %v778_v44 = vrot.slane %v746_v33, 7  ;;  %v779_v46 = vrot.slane %v747_v49, 7  ;;  %v780_v29 = vrot.slane %v748_v0, 7 }
  0x84   : > { %v781_v39 = vrot.slane %v749_v3, 7  ;;  %v782_v54 = vrot.slane %v750_v4, 7  ;;  %v783_v1 = vrot.slane %v751_v5, 7  ;;  %v784_v53 = vrot.slane %v752_v9, 7 }
  0x85   : > { %v785_v40 = vrot.slane %v753_v10, 7  ;;  %v786_v55 = vrot.slane %v754_v15, 7  ;;  %v787_v56 = vrot.slane %v755_v16, 7  ;;  %v788_v58 = vrot.slane %v756_v17, 7 }
  0x86   : > { %v2209_v59 = vadd.f32 %v773_v8, %v723_v48  ;;  %v2211_v60 = vadd.f32 %v774_v11, %v724_v50  ;;  %v2213_v36 = vadd.f32 %v775_v31, %v725_v25  ;;  %v2215_v61 = vadd.f32 %v776_v42, %v726_v24 }
  0x87   : > { %v2217_v62 = vadd.f32 %v777_v43, %v727_v12  ;;  %v2219_v63 = vadd.f32 %v778_v44, %v728_v30  ;;  %v2221_v6 = vadd.f32 %v779_v46, %v729_v57  ;;  %v2223_v7 = vadd.f32 %v780_v29, %v730_v38 }
  0x88   : > { %v2225_v52 = vadd.f32 %v781_v39, %v731_v18  ;;  %v2227_v37 = vadd.f32 %v782_v54, %v732_v19  ;;  %v2229_v48 = vadd.f32 %v783_v1, %v733_v20  ;;  %v2231_v50 = vadd.f32 %v784_v53, %v734_v2 }
  0x89   : > { %v2233_v25 = vadd.f32 %v785_v40, %v735_v14  ;;  %v2235_v24 = vadd.f32 %v786_v55, %v736_v21  ;;  %v2237_v12 = vadd.f32 %v787_v56, %v737_v23  ;;  %v837_v30 = vrot.slane %v2213_v36, 7 }
  0x8a   : > { %v840_v57 = vrot.slane %v2217_v62, 6  ;;  %v2241_v38 = vadd.f32 %v788_v58, %v738_v27  ;;  %v843_v18 = vrot.slane %v2221_v6, 5  ;;  %v846_v19 = vrot.slane %v2225_v52, 4 }
  0x8b   : > { %v839_v20 = vsel %vm838_vm0, %v837_v30, %v2209_v59  ;;  %vm847_vm3 = vcmask 1044484   ;;  %v849_v2 = vrot.slane %v2229_v48, 3  ;;  %vm850_vm4 = vcmask 1045509  }
  0x8c   : > { %v842_v14 = vsel %vm841_vm1, %v840_v57, %v839_v20  ;;  %v852_v21 = vrot.slane %v2233_v25, 2  ;;  %vm853_vm5 = vcmask 1046534   ;;  %v855_v23 = vrot.slane %v2237_v12, 1 }
  0x8d   : > { %v845_v27 = vsel %vm844_vm2, %v843_v18, %v842_v14  ;;  %v858_v51 = vrot.slane %v2215_v61, 7  ;;  %v860_v47 = vrot.slane %v2219_v63, 6  ;;  %v862_v35 = vrot.slane %v2223_v7, 5 }
  0x8e   : > { %v848_v13 = vsel %vm847_vm3, %v846_v19, %v845_v27  ;;  %vm856_vm6 = vcmask 1047559   ;;  %v864_v45 = vrot.slane %v2227_v37, 4  ;;  %v866_v28 = vrot.slane %v2231_v50, 3 }
  0x8f   : > { %v851_v41 = vsel %vm850_vm4, %v849_v2, %v848_v13  ;;  %v859_v33 = vsel %vm838_vm0, %v858_v51, %v2211_v60  ;;  %v868_v49 = vrot.slane %v2235_v24, 2  ;;  %v870_v0 = vrot.slane %v2241_v38, 1 }
  0x90   : > { %v854_v3 = vsel %vm853_vm5, %v852_v21, %v851_v41  ;;  %v861_v4 = vsel %vm841_vm1, %v860_v47, %v859_v33  ;;  %v877_v5 = vmul.f32 %v2209_v59, %v2209_v59  ;;  %v878_v32 = vmul.f32 %v2211_v60, %v2211_v60 }
  0x91   : > { %v857_v9 = vsel %vm856_vm6, %v855_v23, %v854_v3  ;;  %v863_v22 = vsel %vm844_vm2, %v862_v35, %v861_v4  ;;  %v879_v10 = vmul.f32 %v2213_v36, %v2213_v36  ;;  %v880_v34 = vmul.f32 %v2215_v61, %v2215_v61 }
  0x92   : > { %v865_v15 = vsel %vm847_vm3, %v864_v45, %v863_v22  ;;  %v881_v26 = vmul.f32 %v2217_v62, %v2217_v62  ;;  %v882_v16 = vmul.f32 %v2219_v63, %v2219_v63  ;;  %v883_v17 = vmul.f32 %v2221_v6, %v2221_v6 }
  0x93   : > { %v867_v8 = vsel %vm850_vm4, %v866_v28, %v865_v15  ;;  %v884_v11 = vmul.f32 %v2223_v7, %v2223_v7  ;;  %v885_v31 = vmul.f32 %v2225_v52, %v2225_v52  ;;  %v887_v42 = vmul.f32 %v2229_v48, %v2229_v48 }
  0x94   : > { %v869_v43 = vsel %vm853_vm5, %v868_v49, %v867_v8  ;;  %v886_v44 = vmul.f32 %v2227_v37, %v2227_v37  ;;  %v888_v46 = vmul.f32 %v2231_v50, %v2231_v50  ;;  %v889_v29 = vmul.f32 %v2233_v25, %v2233_v25 }
  0x95   : > { %v871_v39 = vsel %vm856_vm6, %v870_v0, %v869_v43  ;;  %v890_v54 = vmul.f32 %v2235_v24, %v2235_v24  ;;  %v891_v1 = vmul.f32 %v2237_v12, %v2237_v12  ;;  %v909_v53 = vrot.slane %v879_v10, 7 }
  0x96   : > { %v874_v40 = vadd.f32 %v871_v39, %v857_v9  ;;  %v911_v55 = vrot.slane %v881_v26, 6  ;;  %v913_v56 = vrot.slane %v883_v17, 5  ;;  %v915_v58 = vrot.slane %v885_v31, 4 }
  0x97   : > { %v892_v30 = vmul.f32 %v2241_v38, %v2241_v38  ;;  %v910_v57 = vsel %vm838_vm0, %v909_v53, %v877_v5  ;;  %v917_v18 = vrot.slane %v887_v42, 3  ;;  %v919_v19 = vrot.slane %v889_v29, 2 }
  0x98   : > { %875 = vadd.xlane.f32.xlu0 %v874_v40  ;;  %v912_v20 = vsel %vm841_vm1, %v911_v55, %v910_v57  ;;  %v923_v2 = vrot.slane %v880_v34, 7  ;;  %v925_v14 = vrot.slane %v882_v16, 6  ;;  %v927_v21 = vrot.slane %v884_v11, 5 }
  0x99   : > { %v914_v23 = vsel %vm844_vm2, %v913_v56, %v912_v20  ;;  %v929_v27 = vrot.slane %v886_v44, 4  ;;  %v921_v47 = vrot.slane %v891_v1, 1  ;;  %v931_v13 = vrot.slane %v888_v46, 3 }
  0x9a   : > { %v916_v51 = vsel %vm847_vm3, %v915_v58, %v914_v23  ;;  %v924_v35 = vsel %vm838_vm0, %v923_v2, %v878_v32  ;;  %v933_v41 = vrot.slane %v890_v54, 2  ;;  %v935_v0 = vrot.slane %v892_v30, 1  ;;  %v975_v2 = vld [vmem:[%s209_s19] sm:$0xff] }
  0x9b   : > { %v918_v45 = vsel %vm850_vm4, %v917_v18, %v916_v51  ;;  %v926_v28 = vsel %vm841_vm1, %v925_v14, %v924_v35  ;;  %v1784_v46 = vmov 0   ;;  %v1786_v51 = vmov 1  }
  0x9c   : > { %v920_v33 = vsel %vm853_vm5, %v919_v19, %v918_v45  ;;  %v928_v49 = vsel %vm844_vm2, %v927_v21, %v926_v28  ;;  %1597 = vset.pattern.permute.xlu1 %v1784_v46  ;;  %1598 = vset.pattern.permute.xlu2 %v1786_v51 }
  0x9d   : > { %v930_v3 = vsel %vm847_vm3, %v929_v27, %v928_v49  ;;  %v922_v4 = vsel %vm856_vm6, %v921_v47, %v920_v33  ;;  %1599 = vset.pattern.permute.xlu0 %v1786_v51 }
  0x9e   : > { %v932_v5 = vsel %vm850_vm4, %v931_v13, %v930_v3 }
  0x9f   : > { %v934_v9 = vsel %vm853_vm5, %v933_v41, %v932_v5 }
  0xa0   : > { %v936_v32 = vsel %vm856_vm6, %v935_v0, %v934_v9 }
  0xa1   : > { %v939_v22 = vadd.f32 %v936_v32, %v922_v4 }
  0xa3   : > { %940 = vadd.xlane.f32.xlu0 %v939_v22 }
 0x10b   : > { %v876_v10 = vpop.xlane.xlu0 %875 }
 0x10c   : > { %v942_v34 = vmul.f32 0.00390625, %v876_v10 }
 0x10e   : > { %v943_v15 = vmul.f32 %v942_v34, %v876_v10 }
 0x116   : > { %v941_v26 = vpop.xlane.xlu0 %940 }
 0x117   : > { %v944_v16 = vsub.f32 %v941_v26, %v943_v15 }
 0x119   : > { %v945_v17 = vmul.f32 0.003921569, %v944_v16 }
 0x11b   : > { %v946_v8 = vmax.f32 %v945_v17, 0.0 }
 0x11d   : > { %1600 = vrsqrt.f32 %v946_v8  ;;  %vm954_vm7 = vcmp.eq.f32.partialorder %v946_v8, inf  ;;  %v957_v54 = vand.u32 2147483648, %v946_v8  ;;  %vm956_vm8 = vcmp.eq.f32.partialorder %v946_v8, 0.0 }
 0x123   : > { %v1601_v11 = vpop.eup %1600 }
 0x124   : > { %v948_v31 = vmul.f32 %v1601_v11, %v946_v8 }
 0x126   : > { %v949_v42 = vmul.f32 %v1601_v11, %v948_v31 }
 0x128   : > { %v950_v43 = vmul.f32 0.5, %v949_v42 }
 0x12a   : > { %v951_v44 = vsub.f32 1.5, %v950_v43 }
 0x12c   : > { %v952_v29 = vmul.f32 %v1601_v11, %v951_v44 }
 0x12e   : > { %v953_v39 = vmul.f32 %v952_v29, %v946_v8 }
 0x130   : > { %v955_v1 = vsel %vm954_vm7, %v946_v8, %v953_v39 }
 0x131   : > { %v958_v53 = vsel %vm956_vm8, %v957_v54, %v955_v1 }
 0x132   : > { %v959_v40 = vadd.f32 1e-05, %v958_v53 }
 0x134   : > { %1602 = vrcp.f32 %v959_v40  ;;  %v971_v30 = vand.u32 2147483648, %v959_v40  ;;  %v969_v18 = vand.u32 2147483647, %v959_v40  ;;  %vm965_vm10 = vweird.f32 %v959_v40 }
 0x136   : > { %v972_v20 = vor.u32 1.1754944e-38, %v971_v30  ;;  %vm970_vm12 = vcmp.eq.f32.partialorder %v969_v18, 8.507059e+37 }
 0x13a   : > { %v1603_v55 = vpop.eup %1602 }
 0x13b   : > { %v961_v56 = vmul.f32 %v1603_v55, %v959_v40  ;;  %vm966_vm9 = vweird.f32 %v1603_v55 }
 0x13c   : > { %vm967_vm11 = vmor %vm965_vm10, %vm966_vm9 }
 0x13d   : > { %v962_v58 = vsub.f32 1.0, %v961_v56 }
 0x13f   : > { %v963_v57 = vmul.f32 %v1603_v55, %v962_v58 }
 0x141   : > { %v964_v19 = vadd.f32 %v1603_v55, %v963_v57 }
 0x143   : > { %v968_v14 = vsel %vm967_vm11, %v1603_v55, %v964_v19 }
 0x144   : > { %v973_v21 = vsel %vm970_vm12, %v972_v20, %v968_v14 }
 0x145   : > { %v976_v23 = vmul.f32 %v975_v2, %v973_v21 }
 0x147   : > { %v977_v27 = vmul.f32 %v976_v23, %v942_v34 }
 0x149   : > { %979 = vrot.lane.b32.xlu1 %v977_v27, %s1785_s20 }
 0x151   : > { %985 = vperm.xlu1 %1597, %v976_v23  }
 0x1bb   : > { %v980_v47 = vpop.permute.xlu1 %979 }
 0x1bc   : > { %v982_v35 = vsub.f32 %v975_v2, %v980_v47 }
 0x1be   : > { %1020 = vperm.xlu2 %1598, %v982_v35  }
 0x1c3   : > { %v2322_v13 = vpop.permute.xlu1 %985 }
 0x1c4   : > { %v987_v45 = vrot.slane %v2322_v13, 1  ;;  %v988_v28 = vrot.slane %v2322_v13, 2  ;;  %v989_v41 = vrot.slane %v2322_v13, 3  ;;  %v1002_v33 = vmul.f32 %v2322_v13, %v2209_v59 }
 0x1c5   : > { %v1003_v0 = vmul.f32 %v2322_v13, %v2211_v60  ;;  %v990_v9 = vrot.slane %v2322_v13, 4  ;;  %v991_v32 = vrot.slane %v2322_v13, 5  ;;  %v993_v26 = vrot.slane %v2322_v13, 7 }
 0x1c6   : > { %v1004_v3 = vmul.f32 %v987_v45, %v2213_v36  ;;  %v1005_v22 = vmul.f32 %v987_v45, %v2215_v61  ;;  %v1006_v59 = vmul.f32 %v988_v28, %v2217_v62  ;;  %v992_v36 = vrot.slane %v2322_v13, 6 }
 0x1c7   : > { %v1007_v16 = vmul.f32 %v988_v28, %v2219_v63  ;;  %v1008_v8 = vmul.f32 %v989_v41, %v2221_v6  ;;  %v1009_v61 = vmul.f32 %v989_v41, %v2223_v7  ;;  %v1010_v62 = vmul.f32 %v990_v9, %v2225_v52 }
 0x1c8   : > { %v1011_v42 = vmul.f32 %v990_v9, %v2227_v37  ;;  %v1012_v63 = vmul.f32 %v991_v32, %v2229_v48  ;;  %v1013_v6 = vmul.f32 %v991_v32, %v2231_v50  ;;  %v1014_v37 = vmul.f32 %v992_v36, %v2233_v25 }
 0x1c9   : > { %v1015_v48 = vmul.f32 %v992_v36, %v2235_v24  ;;  %v1016_v19 = vmul.f32 %v993_v26, %v2237_v12 }
 0x218   : > { %v2329_v49 = vpop.permute.xlu2 %1020 }
 0x219   : > { %v1022_v4 = vrot.slane %v2329_v49, 1  ;;  %v1023_v5 = vrot.slane %v2329_v49, 2  ;;  %v1037_v10 = vadd.f32 %v2329_v49, %v1002_v33  ;;  %v1024_v34 = vrot.slane %v2329_v49, 3 }
 0x21a   : > { %v1038_v60 = vadd.f32 %v2329_v49, %v1003_v0  ;;  %v1025_v11 = vrot.slane %v2329_v49, 4  ;;  %v1026_v46 = vrot.slane %v2329_v49, 5  ;;  %v1027_v53 = vrot.slane %v2329_v49, 6 }
 0x21b   : > { %v1039_v15 = vadd.f32 %v1022_v4, %v1004_v3  ;;  %v1040_v17 = vadd.f32 %v1022_v4, %v1005_v22  ;;  %v1041_v31 = vadd.f32 %v1023_v5, %v1006_v59  ;;  %v1042_v43 = vadd.f32 %v1023_v5, %v1007_v16 }
 0x21c   : > { %v1518_v44 = vmul.f32 -1.442695, %v1037_v10  ;;  %v1043_v29 = vadd.f32 %v1024_v34, %v1008_v8  ;;  %v1519_v39 = vmul.f32 -1.442695, %v1038_v60  ;;  %v1044_v1 = vadd.f32 %v1024_v34, %v1009_v61 }
 0x21d   : > { %v1520_v54 = vmul.f32 -1.442695, %v1039_v15  ;;  %v1521_v7 = vmul.f32 -1.442695, %v1040_v17  ;;  %v1045_v40 = vadd.f32 %v1025_v11, %v1010_v62  ;;  %v1522_v52 = vmul.f32 -1.442695, %v1041_v31 }
 0x21e   : > { %1604 = vpow2.f32 %v1518_v44  ;;  %v1046_v55 = vadd.f32 %v1025_v11, %v1011_v42  ;;  %v1523_v56 = vmul.f32 -1.442695, %v1042_v43  ;;  %v1028_v58 = vrot.slane %v2329_v49, 7 }
 0x21f   : > { %1606 = vpow2.f32 %v1519_v39  ;;  %v1047_v30 = vadd.f32 %v1026_v46, %v1012_v63  ;;  %v1524_v57 = vmul.f32 -1.442695, %v1043_v29  ;;  %v1048_v50 = vadd.f32 %v1026_v46, %v1013_v6 }
 0x220   : > { %1608 = vpow2.f32 %v1520_v54  ;;  %v1525_v18 = vmul.f32 -1.442695, %v1044_v1  ;;  %v1049_v20 = vadd.f32 %v1027_v53, %v1014_v37  ;;  %v1526_v2 = vmul.f32 -1.442695, %v1045_v40 }
 0x221   : > { %1610 = vpow2.f32 %v1521_v7  ;;  %v1050_v14 = vadd.f32 %v1027_v53, %v1015_v48  ;;  %v1527_v25 = vmul.f32 -1.442695, %v1046_v55  ;;  %v1051_v23 = vadd.f32 %v1028_v58, %v1016_v19 }
 0x222   : > { %1612 = vpow2.f32 %v1522_v52  ;;  %v1528_v27 = vmul.f32 -1.442695, %v1047_v30  ;;  %v1529_v47 = vmul.f32 -1.442695, %v1048_v50  ;;  %v1530_v24 = vmul.f32 -1.442695, %v1049_v20 }
 0x223   : > { %1614 = vpow2.f32 %v1523_v56  ;;  %v1531_v45 = vmul.f32 -1.442695, %v1050_v14  ;;  %v1532_v28 = vmul.f32 -1.442695, %v1051_v23  ;;  %v1017_v0 = vmul.f32 %v993_v26, %v2241_v38 }
 0x224   : > { %v1605_v21 = vpop.eup %1604  ;;  %1616 = vpow2.f32 %v1524_v57 }
 0x225   : > { %v1607_v51 = vpop.eup %1606  ;;  %1618 = vpow2.f32 %v1525_v18  ;;  %v2359_v33 = vadd.f32 1.0, %v1605_v21  ;;  %v1052_v32 = vadd.f32 %v1028_v58, %v1017_v0 }
 0x226   : > { %v1609_v35 = vpop.eup %1608  ;;  %1620 = vpow2.f32 %v1526_v2  ;;  %v2362_v3 = vadd.f32 1.0, %v1607_v51 }
 0x227   : > { %v1611_v13 = vpop.eup %1610  ;;  %1622 = vpow2.f32 %v1527_v25  ;;  %v2364_v5 = vadd.f32 1.0, %v1609_v35  ;;  %v1128_v36 = vand.u32 2147483648, %v2359_v33  ;;  %v1533_v16 = vmul.f32 -1.442695, %v1052_v32 }
 0x228   : > { %v1613_v12 = vpop.eup %1612  ;;  %1624 = vpow2.f32 %v1528_v27  ;;  %v2366_v22 = vadd.f32 1.0, %v1611_v13  ;;  %v1143_v8 = vand.u32 2147483648, %v2362_v3  ;;  %v1126_v31 = vand.u32 2147483647, %v2359_v33 }
 0x229   : > { %v1615_v41 = vpop.eup %1614  ;;  %1626 = vpow2.f32 %v1529_v47  ;;  %v2368_v59 = vadd.f32 1.0, %v1613_v12  ;;  %v2385_v62 = vor.u32 1.1754944e-38, %v1128_v36  ;;  %v1141_v42 = vand.u32 2147483647, %v2362_v3 }
 0x22a   : > { %v1617_v49 = vpop.eup %1616  ;;  %1628 = vpow2.f32 %v1530_v24  ;;  %v2371_v60 = vadd.f32 1.0, %v1615_v41  ;;  %v1158_v29 = vand.u32 2147483648, %v2364_v5  ;;  %v2400_v63 = vor.u32 1.1754944e-38, %v1143_v8 }
 0x22b   : > { %v1619_v4 = vpop.eup %1618  ;;  %1630 = vpow2.f32 %v1531_v45  ;;  %v2374_v15 = vadd.f32 1.0, %v1617_v49  ;;  %v1156_v6 = vand.u32 2147483647, %v2364_v5  ;;  %v1173_v1 = vand.u32 2147483648, %v2366_v22 }
 0x22c   : > { %v1621_v9 = vpop.eup %1620  ;;  %1632 = vpow2.f32 %v1532_v28  ;;  %v2391_v44 = vadd.f32 1.0, %v1619_v4  ;;  %v1171_v37 = vand.u32 2147483647, %v2366_v22  ;;  %vm1122_vm13 = vweird.f32 %v2359_v33 }
 0x22d   : > { %v1623_v10 = vpop.eup %1622  ;;  %1634 = vrcp.f32 %v2359_v33  ;;  %v2406_v53 = vadd.f32 1.0, %v1621_v9  ;;  %vm1137_vm14 = vweird.f32 %v2362_v3  ;;  %v2425_v19 = vor.u32 1.1754944e-38, %v1158_v29 }
 0x22e   : > { %v1625_v34 = vpop.eup %1624  ;;  %1636 = vrcp.f32 %v2362_v3  ;;  %v2408_v40 = vadd.f32 1.0, %v1623_v10  ;;  %vm1152_vm15 = vweird.f32 %v2364_v5  ;;  %v2434_v21 = vor.u32 1.1754944e-38, %v1173_v1 }
 0x22f   : > { %v1627_v38 = vpop.eup %1626  ;;  %1638 = vrcp.f32 %v2364_v5  ;;  %v2415_v56 = vadd.f32 1.0, %v1625_v34  ;;  %vm1167_vm0 = vweird.f32 %v2366_v22  ;;  %v1186_v47 = vand.u32 2147483647, %v2368_v59 }
 0x230   : > { %v1629_v26 = vpop.eup %1628  ;;  %1640 = vrcp.f32 %v2366_v22  ;;  %v2422_v50 = vadd.f32 1.0, %v1627_v38  ;;  %v1188_v35 = vand.u32 2147483648, %v2368_v59  ;;  %v1201_v0 = vand.u32 2147483647, %v2371_v60 }
 0x231   : > { %v1631_v17 = vpop.eup %1630  ;;  %1642 = vrcp.f32 %v2368_v59  ;;  %v2431_v14 = vadd.f32 1.0, %v1629_v26  ;;  %vm2456_vm4 = vcmp.eq.f32.partialorder %v1126_v31, 8.507059e+37  ;;  %vm2460_vm5 = vcmp.eq.f32.partialorder %v1141_v42, 8.507059e+37 }
 0x232   : > { %v1633_v61 = vpop.eup %1632  ;;  %1644 = vrcp.f32 %v2371_v60  ;;  %v2443_v13 = vadd.f32 1.0, %v1631_v17  ;;  %vm2467_vm7 = vcmp.eq.f32.partialorder %v1156_v6, 8.507059e+37  ;;  %v1189_v26 = vor.u32 1.1754944e-38, %v1188_v35 }
 0x233   : > { %v2382_v11 = vpop.eup %1634  ;;  %1646 = vrcp.f32 %v2374_v15  ;;  %v2448_v41 = vadd.f32 1.0, %v1633_v61  ;;  %v1203_v17 = vand.u32 2147483648, %v2371_v60  ;;  %vm2476_vm9 = vcmp.eq.f32.partialorder %v1171_v37, 8.507059e+37 }
 0x234   : > { %v2389_v43 = vpop.eup %1636  ;;  %1648 = vpow2.f32 %v1533_v16  ;;  %v1118_v46 = vmul.f32 %v2382_v11, %v2359_v33  ;;  %vm1123_vm3 = vweird.f32 %v2382_v11  ;;  %vm2480_vm10 = vcmp.eq.f32.partialorder %v1186_v47, 8.507059e+37 }
 0x235   : > { %v2396_v39 = vpop.eup %1638  ;;  %v1133_v54 = vmul.f32 %v2389_v43, %v2362_v3  ;;  %vm1138_vm6 = vweird.f32 %v2389_v43  ;;  %vm2489_vm11 = vmor %vm1122_vm13, %vm1123_vm3  ;;  %vm2495_vm2 = vcmp.eq.f32.partialorder %v1201_v0, 8.507059e+37  ;;  %1650 = vrcp.f32 %v2391_v44 }
 0x236   : > { %v2404_v7 = vpop.eup %1640  ;;  %v1148_v52 = vmul.f32 %v2396_v39, %v2364_v5  ;;  %v1119_v58 = vsub.f32 1.0, %v1118_v46  ;;  %vm1153_vm8 = vweird.f32 %v2396_v39  ;;  %vm2504_vm1 = vmor %vm1137_vm14, %vm1138_vm6  ;;  %v1216_v37 = vand.u32 2147483647, %v2374_v15 }
 0x237   : > { %v2413_v55 = vpop.eup %1642  ;;  %v1134_v30 = vsub.f32 1.0, %v1133_v54  ;;  %v1163_v57 = vmul.f32 %v2404_v7, %v2366_v22  ;;  %vm1168_vm12 = vweird.f32 %v2404_v7  ;;  %vm2514_vm3 = vmor %vm1152_vm15, %vm1153_vm8  ;;  %1652 = vrcp.f32 %v2406_v53 }
 0x238   : > { %v2420_v48 = vpop.eup %1644  ;;  %v1149_v18 = vsub.f32 1.0, %v1148_v52  ;;  %v1178_v20 = vmul.f32 %v2413_v55, %v2368_v59  ;;  %v1120_v45 = vmul.f32 %v2382_v11, %v1119_v58  ;;  %vm1183_vm13 = vweird.f32 %v2413_v55  ;;  %vm2532_vm15 = vmor %vm1167_vm0, %vm1168_vm12 }
 0x239   : > { %v2429_v2 = vpop.eup %1646  ;;  %v1164_v25 = vsub.f32 1.0, %v1163_v57  ;;  %v1193_v23 = vmul.f32 %v2420_v48, %v2371_v60  ;;  %v1135_v12 = vmul.f32 %v2389_v43, %v1134_v30  ;;  %vm1198_vm14 = vweird.f32 %v2420_v48 }
 0x23a   : > { %v1649_v27 = vpop.eup %1648  ;;  %v1179_v51 = vsub.f32 1.0, %v1178_v20  ;;  %v1208_v24 = vmul.f32 %v2429_v2, %v2374_v15  ;;  %v1150_v49 = vmul.f32 %v2396_v39, %v1149_v18  ;;  %v1121_v8 = vadd.f32 %v2382_v11, %v1120_v45 }
 0x23b   : > { %v1194_v28 = vsub.f32 1.0, %v1193_v23  ;;  %v2453_v9 = vadd.f32 1.0, %v1649_v27  ;;  %v1165_v34 = vmul.f32 %v2404_v7, %v1164_v25  ;;  %v1136_v61 = vadd.f32 %v2389_v43, %v1135_v12 }
 0x23c   : > { %v1209_v4 = vsub.f32 1.0, %v1208_v24  ;;  %v1180_v38 = vmul.f32 %v2413_v55, %v1179_v51  ;;  %v1151_v54 = vadd.f32 %v2396_v39, %v1150_v49  ;;  %v1218_v30 = vand.u32 2147483648, %v2374_v15 }
 0x23d   : > { %v1195_v16 = vmul.f32 %v2420_v48, %v1194_v28  ;;  %v1166_v1 = vadd.f32 %v2404_v7, %v1165_v34  ;;  %v1125_v57 = vsel %vm2489_vm11, %v2382_v11, %v1121_v8  ;;  %v1140_v5 = vsel %vm2504_vm1, %v2389_v43, %v1136_v61 }
 0x23e   : > { %v1210_v46 = vmul.f32 %v2429_v2, %v1209_v4  ;;  %v1181_v52 = vadd.f32 %v2413_v55, %v1180_v38  ;;  %vm1213_vm6 = vweird.f32 %v2429_v2  ;;  %v1155_v11 = vsel %vm2514_vm3, %v2396_v39, %v1151_v54  ;;  %v2568_v39 = vpop.eup %1650 }
 0x23f   : > { %v1196_v3 = vadd.f32 %v2420_v48, %v1195_v16  ;;  %vm3048_vm8 = vweird.f32 %v2368_v59  ;;  %v1204_v25 = vor.u32 1.1754944e-38, %v1203_v17  ;;  %vm1212_vm0 = vweird.f32 %v2374_v15  ;;  %v2600_v35 = vpop.eup %1652  ;;  %v1668_v15 = vld [vmem:[%s1901_s6] sm:$0xff] }
 0x240   : > { %v1211_v20 = vadd.f32 %v2429_v2, %v1210_v46  ;;  %vm2543_vm11 = vmor %vm3048_vm8, %vm1183_vm13  ;;  %1654 = vrcp.f32 %v2408_v40  ;;  %v1170_v22 = vsel %vm2532_vm15, %v2404_v7, %v1166_v1  ;;  %vm3051_vm1 = vweird.f32 %v2371_v60 }
 0x241   : > { %v1185_v23 = vsel %vm2543_vm11, %v2413_v55, %v1181_v52  ;;  %vm2559_vm12 = vmor %vm3051_vm1, %vm1198_vm14  ;;  %vm2563_vm13 = vcmp.eq.f32.partialorder %v1216_v37, 8.507059e+37  ;;  %1656 = vrcp.f32 %v2415_v56  ;;  %v2573_v7 = vsel %vm2456_vm4, %v2385_v62, %v1125_v57 }
 0x242   : > { %v2578_v60 = vsel %vm2460_vm5, %v2400_v63, %v1140_v5  ;;  %v1200_v55 = vsel %vm2559_vm12, %v2420_v48, %v1196_v3  ;;  %vm2585_vm3 = vmor %vm1212_vm0, %vm1213_vm6  ;;  %v1233_v51 = vand.u32 2147483648, %v2391_v44  ;;  %v2593_v62 = vsel %vm2467_vm7, %v2425_v19, %v1155_v11  ;;  %v1681_v3 = vld [vmem:[%s1901_s6 + $0x68] sm:$0xff] }
 0x243   : > { %v1215_v63 = vsel %vm2585_vm3, %v2429_v2, %v1211_v20  ;;  %v1219_v47 = vor.u32 1.1754944e-38, %v1218_v30  ;;  %v1223_v48 = vmul.f32 %v2568_v39, %v2391_v44  ;;  %v2605_v24 = vsel %vm2476_vm9, %v2434_v21, %v1170_v22 }
 0x244   : > { %v2609_v45 = vsel %vm2480_vm10, %v1189_v26, %v1185_v23  ;;  %v1248_v19 = vand.u32 2147483648, %v2406_v53  ;;  %1658 = vrcp.f32 %v2422_v50  ;;  %v2615_v2 = vsel %vm2495_vm2, %v1204_v25, %v1200_v55 }
 0x245   : > { %v1224_v12 = vsub.f32 1.0, %v1223_v48  ;;  %v1231_v28 = vand.u32 2147483647, %v2391_v44  ;;  %v1238_v49 = vmul.f32 %v2600_v35, %v2406_v53  ;;  %v2624_v0 = vsel %vm2563_vm13, %v1219_v47, %v1215_v63 }
 0x246   : > { %v2620_v21 = vpop.eup %1654  ;;  %vm1227_vm4 = vweird.f32 %v2391_v44  ;;  %v2627_v4 = vor.u32 1.1754944e-38, %v1233_v51  ;;  %v1246_v32 = vand.u32 2147483647, %v2406_v53  ;;  %1660 = vrcp.f32 %v2431_v14 }
 0x247   : > { %v2631_v10 = vpop.eup %1656  ;;  %v1239_v34 = vsub.f32 1.0, %v1238_v49  ;;  %vm1242_vm2 = vweird.f32 %v2406_v53  ;;  %v1253_v38 = vmul.f32 %v2620_v21, %v2408_v40  ;;  %v1263_v36 = vand.u32 2147483648, %v2408_v40 }
 0x248   : > { %v1278_v26 = vand.u32 2147483648, %v2415_v56  ;;  %v2638_v16 = vor.u32 1.1754944e-38, %v1248_v19  ;;  %vm1257_vm5 = vweird.f32 %v2408_v40  ;;  %v1261_v17 = vand.u32 2147483647, %v2408_v40 }
 0x249   : > { %v1268_v8 = vmul.f32 %v2631_v10, %v2415_v56  ;;  %v1225_v61 = vmul.f32 %v2568_v39, %v1224_v12  ;;  %vm1228_vm7 = vweird.f32 %v2568_v39  ;;  %v1254_v31 = vsub.f32 1.0, %v1253_v38 }
 0x24a   : > { %vm1272_vm9 = vweird.f32 %v2415_v56  ;;  %v1276_v42 = vand.u32 2147483647, %v2415_v56  ;;  %v2648_v46 = vpop.eup %1658  ;;  %v1240_v29 = vmul.f32 %v2600_v35, %v1239_v34  ;;  %v1291_v6 = vand.u32 2147483647, %v2422_v50  ;;  %vm2694_vm3 = vmor %vm1227_vm4, %vm1228_vm7 }
 0x24b   : > { %v1269_v54 = vsub.f32 1.0, %v1268_v8  ;;  %1662 = vrcp.f32 %v2443_v13  ;;  %v1255_v33 = vmul.f32 %v2620_v21, %v1254_v31  ;;  %v1264_v1 = vor.u32 1.1754944e-38, %v1263_v36 }
 0x24c   : > { %v1279_v52 = vor.u32 1.1754944e-38, %v1278_v26  ;;  %v1283_v37 = vmul.f32 %v2648_v46, %v2422_v50  ;;  %v2656_v58 = vpop.eup %1660  ;;  %vm2658_vm10 = vcmp.eq.f32.partialorder %v1231_v28, 8.507059e+37  ;;  %vm1243_vm14 = vweird.f32 %v2600_v35 }
 0x24d   : > { %vm2663_vm15 = vcmp.eq.f32.partialorder %v1246_v32, 8.507059e+37  ;;  %v1270_v57 = vmul.f32 %v2631_v10, %v1269_v54  ;;  %vm1287_vm6 = vweird.f32 %v2422_v50  ;;  %v1293_v5 = vand.u32 2147483648, %v2422_v50  ;;  %vm2707_vm0 = vmor %vm1242_vm2, %vm1243_vm14 }
 0x24e   : > { %v1226_v18 = vadd.f32 %v2568_v39, %v1225_v61  ;;  %vm2671_vm8 = vcmp.eq.f32.partialorder %v1261_v17, 8.507059e+37  ;;  %vm2675_vm11 = vcmp.eq.f32.partialorder %v1276_v42, 8.507059e+37  ;;  %v1284_v43 = vsub.f32 1.0, %v1283_v37 }
 0x24f   : > { %v1298_v25 = vmul.f32 %v2656_v58, %v2431_v14  ;;  %v1306_v22 = vand.u32 2147483647, %v2431_v14  ;;  %v1241_v23 = vadd.f32 %v2600_v35, %v1240_v29  ;;  %vm1258_vm1 = vweird.f32 %v2620_v21 }
 0x250   : > { %vm1273_vm12 = vweird.f32 %v2631_v10  ;;  %vm2686_vm13 = vcmp.eq.f32.partialorder %v1291_v6, 8.507059e+37  ;;  %v1256_v55 = vadd.f32 %v2620_v21, %v1255_v33  ;;  %v1271_v27 = vadd.f32 %v2631_v10, %v1270_v57  ;;  %vm2721_vm7 = vmor %vm1257_vm5, %vm1258_vm1 }
 0x251   : > { %v1285_v51 = vmul.f32 %v2648_v46, %v1284_v43  ;;  %v1299_v63 = vsub.f32 1.0, %v1298_v25  ;;  %v2701_v47 = vpop.eup %1662  ;;  %vm1288_vm4 = vweird.f32 %v2648_v46  ;;  %v1294_v44 = vor.u32 1.1754944e-38, %v1293_v5  ;;  %vm2740_vm5 = vmor %vm1272_vm9, %vm1273_vm12 }
 0x252   : > { %v1308_v19 = vand.u32 2147483648, %v2431_v14  ;;  %1664 = vrcp.f32 %v2448_v41  ;;  %v1230_v12 = vsel %vm2694_vm3, %v2568_v39, %v1226_v18  ;;  %vm2727_vm2 = vcmp.eq.f32.partialorder %v1306_v22, 8.507059e+37  ;;  %vm2758_vm9 = vmor %vm1287_vm6, %vm1288_vm4 }
 0x253   : > { %v1286_v28 = vadd.f32 %v2648_v46, %v1285_v51  ;;  %v1300_v49 = vmul.f32 %v2656_v58, %v1299_v63  ;;  %v1313_v34 = vmul.f32 %v2701_v47, %v2443_v13  ;;  %v1245_v39 = vsel %vm2707_vm0, %v2600_v35, %v1241_v23  ;;  %v1669_v63 = vld [vmem:[%s1901_s6 + $0x8] sm:$0xff] }
 0x254   : > { %vm1303_vm14 = vweird.f32 %v2656_v58  ;;  %vm1317_vm1 = vweird.f32 %v2443_v13  ;;  %v1321_v38 = vand.u32 2147483647, %v2443_v13  ;;  %v1323_v36 = vand.u32 2147483648, %v2443_v13 }
 0x255   : > { %v1260_v35 = vsel %vm2721_vm7, %v2620_v21, %v1256_v55  ;;  %v1275_v56 = vsel %vm2740_vm5, %v2631_v10, %v1271_v27  ;;  %v1301_v17 = vadd.f32 %v2656_v58, %v1300_v49  ;;  %v1314_v8 = vsub.f32 1.0, %v1313_v34  ;;  %v1673_v34 = vld [vmem:[%s1901_s6 + $0x28] sm:$0xff] }
 0x256   : > { %v1290_v61 = vsel %vm2758_vm9, %v2648_v46, %v1286_v28  ;;  %v1336_v21 = vand.u32 2147483647, %v2448_v41  ;;  %v1338_v31 = vand.u32 2147483648, %v2448_v41  ;;  %1666 = vrcp.f32 %v2453_v9  ;;  %v1672_v28 = vld [vmem:[%s1901_s6 + $0x20] sm:$0xff] }
 0x257   : > { %v2772_v50 = vsel %vm2658_vm10, %v2627_v4, %v1230_v12  ;;  %v2777_v10 = vsel %vm2663_vm15, %v2638_v16, %v1245_v39  ;;  %v1309_v42 = vor.u32 1.1754944e-38, %v1308_v19  ;;  %v1315_v29 = vmul.f32 %v2701_v47, %v1314_v8  ;;  %v1671_v12 = vld [vmem:[%s1901_s6 + $0x18] sm:$0xff]  ;;  %v1678_v4 = vld [vmem:[%s1901_s6 + $0x50] sm:$0xff] }
 0x258   : > { %v2780_v46 = vpop.eup %1664  ;;  %v2784_v54 = vsel %vm2671_vm8, %v1264_v1, %v1260_v35  ;;  %v2788_v6 = vsel %vm2675_vm11, %v1279_v52, %v1275_v56  ;;  %vm3080_vm10 = vweird.f32 %v2431_v14  ;;  %vm1318_vm15 = vweird.f32 %v2701_v47  ;;  %v1675_v8 = vld [vmem:[%s1901_s6 + $0x38] sm:$0xff] }
 0x259   : > { %vm2794_vm6 = vmor %vm3080_vm10, %vm1303_vm14  ;;  %v1324_v16 = vor.u32 1.1754944e-38, %v1323_v36  ;;  %v2801_v33 = vsel %vm2686_vm13, %v1294_v44, %v1290_v61  ;;  %vm2806_vm8 = vcmp.eq.f32.partialorder %v1321_v38, 8.507059e+37  ;;  %v1328_v14 = vmul.f32 %v2780_v46, %v2448_v41  ;;  %v1670_v44 = vld [vmem:[%s1901_s6 + $0x10] sm:$0xff] }
 0x25a   : > { %v1305_v1 = vsel %vm2794_vm6, %v2656_v58, %v1301_v17  ;;  %vm1332_vm11 = vweird.f32 %v2448_v41  ;;  %v1316_v37 = vadd.f32 %v2701_v47, %v1315_v29  ;;  %vm2814_vm0 = vcmp.eq.f32.partialorder %v1336_v21, 8.507059e+37  ;;  %vm2835_vm12 = vmor %vm1317_vm1, %vm1318_vm15  ;;  %v1674_v36 = vld [vmem:[%s1901_s6 + $0x30] sm:$0xff]  ;;  %v1677_v29 = vld [vmem:[%s1901_s6 + $0x48] sm:$0xff] }
 0x25b   : > { %v1339_v30 = vor.u32 1.1754944e-38, %v1338_v31  ;;  %v1357_v57 = vperm.slane %v2573_v7, 0  ;;  %v1329_v5 = vsub.f32 1.0, %v1328_v14  ;;  %v1351_v58 = vand.u32 2147483647, %v2453_v9  ;;  %v1676_v31 = vld [vmem:[%s1901_s6 + $0x40] sm:$0xff] }
 0x25c   : > { %v1358_v18 = vperm.slane %v2578_v60, 0  ;;  %v1359_v20 = vperm.slane %v2593_v62, 0  ;;  %v2822_v11 = vpop.eup %1666  ;;  %v2826_v43 = vsel %vm2727_vm2, %v1309_v42, %v1305_v1  ;;  %v1353_v25 = vand.u32 2147483648, %v2453_v9  ;;  %v1679_v1 = vld [vmem:[%s1901_s6 + $0x58] sm:$0xff]  ;;  %v1680_v14 = vld [vmem:[%s1901_s6 + $0x60] sm:$0xff] }
 0x25d   : > { %v1360_v22 = vperm.slane %v2605_v24, 0  ;;  %v1361_v7 = vperm.slane %v2609_v45, 0  ;;  %v1330_v62 = vmul.f32 %v2780_v46, %v1329_v5  ;;  %vm1333_vm13 = vweird.f32 %v2780_v46 }
 0x25e   : > { %v1343_v23 = vmul.f32 %v2822_v11, %v2453_v9  ;;  %v1362_v24 = vperm.slane %v2615_v2, 0  ;;  %v1320_v45 = vsel %vm2835_vm12, %v2701_v47, %v1316_v37  ;;  %v1363_v13 = vperm.slane %v2624_v0, 0  ;;  %vm2855_vm3 = vmor %vm1332_vm11, %vm1333_vm13 }
 0x25f   : > { %v1364_v59 = vperm.slane %v2772_v50, 0  ;;  %v1373_v55 = vmul.f32 %v1668_v15, %v1357_v57  ;;  %v1331_v27 = vadd.f32 %v2780_v46, %v1330_v62  ;;  %v1374_v48 = vmul.f32 %v1669_v63, %v1358_v18  ;;  %v1682_v57 = vld [vmem:[%s1901_s6 + $0x70] sm:$0xff] }
 0x260   : > { %v1344_v51 = vsub.f32 1.0, %v1343_v23  ;;  %v1375_v2 = vmul.f32 %v1670_v44, %v1359_v20  ;;  %v1365_v0 = vperm.slane %v2777_v10, 0  ;;  %v1366_v19 = vperm.slane %v2784_v54, 0 }
 0x261   : > { %v1376_v53 = vmul.f32 %v1671_v12, %v1360_v22  ;;  %v1377_v49 = vmul.f32 %v1672_v28, %v1361_v7  ;;  %1389 = vst [vmem:[%s2865_s22] sm:$0xff] %v1373_v55  ;;  %v1335_v41 = vsel %vm2855_vm3, %v2780_v46, %v1331_v27  ;;  %vm1348_vm4 = vweird.f32 %v2822_v11 }
 0x262   : > { %v1345_v32 = vmul.f32 %v2822_v11, %v1344_v51  ;;  %v1378_v39 = vmul.f32 %v1673_v34, %v1362_v24  ;;  %1390 = vst [vmem:[%s2865_s22 + $0x8] sm:$0xff] %v1374_v48  ;;  %v1325_v40 = vsel %vm2806_vm8, %v1324_v16, %v1320_v45  ;;  %vm1347_vm7 = vweird.f32 %v2453_v9 }
 0x263   : > { %v1367_v38 = vperm.slane %v2788_v6, 0  ;;  %v1379_v35 = vmul.f32 %v1674_v36, %v1363_v13  ;;  %1391 = vst [vmem:[%s2865_s22 + $0x10] sm:$0xff] %v1375_v2  ;;  %v1340_v56 = vsel %vm2814_vm0, %v1339_v30, %v1335_v41  ;;  %v1368_v17 = vperm.slane %v2801_v33, 0  ;;  %vm1349_vm2 = vmor %vm1347_vm7, %vm1348_vm4 }
 0x264   : > { %v1346_v26 = vadd.f32 %v2822_v11, %v1345_v32  ;;  %v1380_v61 = vmul.f32 %v1675_v8, %v1364_v59  ;;  %1392 = vst [vmem:[%s2865_s22 + $0x18] sm:$0xff] %v1376_v53  ;;  %v1354_v9 = vor.u32 1.1754944e-38, %v1353_v25  ;;  %v1369_v21 = vperm.slane %v2826_v43, 0 }
 0x265   : > { %v1381_v50 = vmul.f32 %v1676_v31, %v1365_v0  ;;  %1393 = vst [vmem:[%s2865_s22 + $0x20] sm:$0xff] %v1377_v49  ;;  %vm1352_vm5 = vcmp.eq.f32.partialorder %v1351_v58, 8.507059e+37  ;;  %v1370_v42 = vperm.slane %v1325_v40, 0  ;;  %v1382_v46 = vmul.f32 %v1677_v29, %v1366_v19  ;;  %v1683_v58 = vld [vmem:[%s1901_s6 + $0x78] sm:$0xff]  ;;  %s1734_s6 = scalar_lea.hbm %s2948_s3, 256 }
 0x266   : > { %v1350_v10 = vsel %vm1349_vm2, %v2822_v11, %v1346_v26  ;;  %1394 = vst [vmem:[%s2865_s22 + $0x28] sm:$0xff] %v1378_v39  ;;  %v1371_v6 = vperm.slane %v1340_v56, 0  ;;  %v1383_v16 = vmul.f32 %v1678_v4, %v1367_v38  ;;  %v1384_v52 = vmul.f32 %v1679_v1, %v1368_v17  ;;  %p1736_p3 = scmp.lt.s32.totalorder %s1734_s6, %s1730_s8 }
 0x267   : > { %v1355_v54 = vsel %vm1352_vm5, %v1354_v9, %v1350_v10  ;;  %1395 = vst [vmem:[%s2865_s22 + $0x30] sm:$0xff] %v1379_v35  ;;  %v1385_v37 = vmul.f32 %v1680_v14, %v1369_v21  ;;  %v1386_v30 = vmul.f32 %v1681_v3, %v1370_v42 }
 0x268   : > { %v1372_v33 = vperm.slane %v1355_v54, 0  ;;  %1396 = vst [vmem:[%s2865_s22 + $0x38] sm:$0xff] %v1380_v61  ;;  %v1387_v5 = vmul.f32 %v1682_v57, %v1371_v6  ;;  %p1737_p4 = por %p1736_p3, %p1735_p1 }
 0x269   : > { %1397 = vst [vmem:[%s2865_s22 + $0x40] sm:$0xff] %v1381_v50 }
 0x26a   : > { %1398 = vst [vmem:[%s2865_s22 + $0x48] sm:$0xff] %v1382_v46  ;;  %v1388_v18 = vmul.f32 %v1683_v58, %v1372_v33  ;;  %p1738_p7 = pnand %p1737_p4, %p1733_p0 }
 0x26b   : > { %1399 = vst [vmem:[%s2865_s22 + $0x50] sm:$0xff] %v1383_v16 }
 0x26c   : > { %1400 = vst [vmem:[%s2865_s22 + $0x58] sm:$0xff] %v1384_v52 }
 0x26d   : > { %1401 = vst [vmem:[%s2865_s22 + $0x60] sm:$0xff] %v1385_v37 }
 0x26e   : > { %1402 = vst [vmem:[%s2865_s22 + $0x68] sm:$0xff] %v1386_v30 }
 0x26f   : > { %1403 = vst [vmem:[%s2865_s22 + $0x70] sm:$0xff] %v1387_v5 }
 0x270   : > { %1404 = vst [vmem:[%s2865_s22 + $0x78] sm:$0xff] %v1388_v18 }
 0x271   : > { %1741 = shalt.err (!%p1738_p7)
}
 0x272   : > { %s1787_s29 = smov 256   ;;  %s1788_s17 = smov 16  }
 0x273   : > { %1546 = dma.vmem_to_hbm [thread:$0]  (%p1859_p11), %s1420_s30, 2048, %s1422_s4, %s1406_s5, %s1787_s29, %s1787_s29, %s1788_s17  }
 0x274 PF: > { %s1436_s19 = sand.u32 1, %s1768_s12   ;;  %p3091_p5 = scmp.ge.s32.totalorder %s1780_s15, 2 }
 0x275   : > { %s1437_s20 = scalar_lea.sflag [#allocation4], %s1436_s19 }
 0x276   : > { %p1553_p8 = pnand %p3091_p5, %p1863_p12 }
 0x278   : > { %p1554_p10 = pneg %p1553_p8 }
 0x27a   : > { %1763 = dma.done.wait (%p1554_p10), %s1437_s20, 2048  }
 0x27b   : > { %1765 = vsyncadd (%p1554_p10), %s1437_s20, 4294965248  ;;  %p16_p2 = scmp.ge.s32.totalorder %s1834_s18, 4   ;;  %s3092_s12 = smov %s1772_s13 }
 0x27c   : > { %s3093_s13 = smov %s1776_s14  ;;  %s3094_s14 = smov %s1846_s21 }
 0x27d   : > { %s3095_s15 = smov %s1834_s18  ;;  %18 = sbr.rel (!%p16_p2) target bundleno = 5 (0x5), region = 80 }
 0x282   :  { %1443 = vsyncpa [#allocation3], 1 }
 0x283   :  { %1445 = vsyncpa [#allocation3 + $0x1], 1 }
 0x284   :  { %1446 = vsyncpa [#allocation4], 1 }
 0x285   :  { %1448 = vsyncpa [#allocation4 + $0x1], 1 }

</bundles_post_ra>
